<compile_context>
chip_gen: v6e
topology: v6e:2x2x1
jax: 0.10.0
libtpu: 0.0.40
codegen_flags: <defaults>
</compile_context>

<pallas_src>
import jax
import jax.numpy as jnp
from jax.experimental import pallas as pl
from jax.experimental.pallas import tpu as pltpu

EPS = 1e-5                       # nn.LayerNorm default eps
_SMALL_PROBLEM_BYTES = 128 * 1024  # below this, a plain XLA fusion wins


def _layernorm_kernel(x_ref, gamma_ref, beta_ref, o_ref):
    # x_ref: (tile_rows, D) tile in VMEM; gamma/beta: (1, D) f32, VMEM-resident.
    x = x_ref[...].astype(jnp.float32)
    d = x.shape[-1]
    inv_d = jnp.float32(1.0 / d)                    # static const -> VPU mul
    mean = jnp.sum(x, axis=-1, keepdims=True) * inv_d
    xc = x - mean
    # Two-pass (centered) variance: keeps precision when |mean| >> std.
    var = jnp.sum(xc * xc, axis=-1, keepdims=True) * inv_d
    scale = jax.lax.rsqrt(var + EPS)                # EUP slot
    # Fused epilogue: no separate normalized-`y` f32 block temporary.
    o_ref[...] = ((xc * scale) * gamma_ref[...] + beta_ref[...]).astype(o_ref.dtype)


def _vmem_capacity_bytes():
    # 128 MiB on v5e/v6e, 64 MiB per TensorCore on v7x. Conservative fallback.
    try:
        return int(pltpu.get_tpu_info().vmem_capacity_bytes)
    except Exception:
        return 64 * 1024 * 1024


def _choose_tile_rows(n_rows, d, itemsize, vmem_cap):
    """Row tile sized by block bytes and an honest VMEM working-set model.

    Returns None if even a 16-row tile does not fit the budget (caller falls
    back to XLA).
    """
    # Per-row VMEM bytes across the pipeline:
    #   2 * itemsize : double-buffered input block
    #   2 * itemsize : double-buffered output block
    #   k * 4        : in-kernel f32 temporaries (x_f32 / centered block);
    #                  f32 inputs reuse the loaded block -> fewer temps.
    n_f32_temps = 3 if itemsize < 4 else 2
    per_row = d * (4 * itemsize + n_f32_temps * 4)

    # Keep the whole pipelined working set well inside physical VMEM.
    budget = int(vmem_cap * 0.40)
    if 16 * per_row > budget:
        # TODO(synk): a D-tiled two-pass (partial sum / sum-sq) kernel would
        # cover very large D here; for now fall back to XLA.
        return None

    # Target each *input block* at multi-MiB so the ~0.35us/step overhead is
    # negligible: 8 MiB on 128 MiB-VMEM parts (v5e/v6e), 4 MiB on v7x.
    target_block_bytes = (8 if vmem_cap >= 96 * 1024 * 1024 else 4) * 1024 * 1024
    tile_by_block = max(1, target_block_bytes // max(d * itemsize, 1))
    tile_by_vmem = max(1, budget // max(per_row, 1))

    tile = min(tile_by_block, tile_by_vmem)
    tile = max(16, (tile // 16) * 16)          # valid sublane packing f32/bf16
    rows_rounded = ((n_rows + 15) // 16) * 16
    tile = min(tile, max(16, rows_rounded))    # never much bigger than problem
    return tile


def _xla_layernorm(x, gamma, beta):
    xf = x.astype(jnp.float32)
    mean = jnp.mean(xf, axis=-1, keepdims=True)
    var = jnp.mean((xf - mean) ** 2, axis=-1, keepdims=True)
    y = (xf - mean) * jax.lax.rsqrt(var + EPS) * gamma.astype(jnp.float32) \
        + beta.astype(jnp.float32)
    return y.astype(x.dtype)


def _wants_core_parallel():
    # Only v7x has 2 TensorCores per chip; elsewhere CORE_PARALLEL buys nothing.
    if getattr(pltpu, "CORE_PARALLEL", None) is None:
        return False
    try:
        kind = jax.devices()[0].device_kind.lower()
    except Exception:
        return False
    return "v7" in kind


def layer_norm(x, gamma, beta):
    """LayerNorm over the last dim of x. gamma, beta: (D,)."""
    orig_shape = x.shape
    D = orig_shape[-1]
    itemsize = jnp.dtype(x.dtype).itemsize
    total_bytes = x.size * itemsize

    # Non-lane-dense D or tiny problems: plain XLA fusion is faster.
    if D % 128 != 0 or total_bytes < _SMALL_PROBLEM_BYTES:
        return _xla_layernorm(x, gamma, beta)

    x2 = x.reshape(-1, D)      # metadata-only reshape, no extra HBM copy
    R = x2.shape[0]

    vmem_cap = _vmem_capacity_bytes()
    tile_rows = _choose_tile_rows(R, D, itemsize, vmem_cap)
    if tile_rows is None:      # gigantic D: does not fit VMEM at 16 rows
        return _xla_layernorm(x, gamma, beta)

    vmem_limit = min(int(vmem_cap * 0.85), 120 * 1024 * 1024)

    # Host-side cast: gamma/beta land in VMEM as f32 once, no per-step cast.
    gamma2 = gamma.astype(jnp.float32).reshape(1, D)
    beta2 = beta.astype(jnp.float32).reshape(1, D)

    def run(dim_sems):
        return pl.pallas_call(
            _layernorm_kernel,
            out_shape=jax.ShapeDtypeStruct((R, D), x.dtype),
            grid_spec=pltpu.PrefetchScalarGridSpec(
                num_scalar_prefetch=0,
                # Ragged last block: OOB output rows are masked on store;
                # garbage rows in the last input block only influence rows
                # that are never written (LayerNorm is row-independent).
                grid=(pl.cdiv(R, tile_rows),),
                in_specs=[
                    pl.BlockSpec((tile_rows, D), lambda i: (i, 0)),
                    pl.BlockSpec((1, D), lambda i: (0, 0)),   # gamma resident
                    pl.BlockSpec((1, D), lambda i: (0, 0)),   # beta  resident
                ],
                out_specs=pl.BlockSpec((tile_rows, D), lambda i: (i, 0)),
            ),
            compiler_params=pltpu.CompilerParams(
                dimension_semantics=dim_sems,
                vmem_limit_bytes=vmem_limit,
            ),
        )(x2, gamma2, beta2)

    if _wants_core_parallel():
        try:
            out = run((pltpu.CORE_PARALLEL,))
        except Exception:
            out = run(("parallel",))
    else:
        out = run(("parallel",))

    return out.reshape(orig_shape)


def _reference(x, gamma, beta):
    xf = x.astype(jnp.float32)
    mean = jnp.mean(xf, axis=-1, keepdims=True)
    var = jnp.mean((xf - mean) ** 2, axis=-1, keepdims=True)
    y = (xf - mean) / jnp.sqrt(var + EPS) * gamma.astype(jnp.float32) \
        + beta.astype(jnp.float32)
    return y.astype(x.dtype)


if __name__ == "__main__":
    key = jax.random.PRNGKey(0)
    k_x1, k_x2, k_x3, k_x4, k_g, k_b = jax.random.split(key, 6)

    D = 128
    gamma = 1.0 + 0.1 * jax.random.normal(k_g, (D,), dtype=jnp.float32)
    beta = 0.1 * jax.random.normal(k_b, (D,), dtype=jnp.float32)

    # 1) Main Pallas path: (batch, seq, dim), lane-dense, above the small-problem cutoff.
    x1 = jax.random.normal(k_x1, (2, 256, D), dtype=jnp.float32)
    y1 = jax.block_until_ready(layer_norm(x1, gamma, beta))
    assert jnp.allclose(y1, _reference(x1, gamma, beta), atol=1e-5, rtol=1e-5)

    # 2) Ragged rows (R = 513 not a multiple of the tile): masked last block.
    x2 = jax.random.normal(k_x2, (3, 171, D), dtype=jnp.float32)
    y2 = jax.block_until_ready(layer_norm(x2, gamma, beta))
    assert jnp.allclose(y2, _reference(x2, gamma, beta), atol=1e-5, rtol=1e-5)

    # 3) Tiny problem: small-shape XLA fallback (avoids launch-overhead regression).
    x3 = jax.random.normal(k_x3, (2, 8, D), dtype=jnp.float32)
    y3 = jax.block_until_ready(layer_norm(x3, gamma, beta))
    assert jnp.allclose(y3, _reference(x3, gamma, beta), atol=1e-5, rtol=1e-5)

    # 4) Non-lane-dense D: XLA fallback.
    Dn = 96
    gn = jnp.ones((Dn,), jnp.float32)
    bn = jnp.zeros((Dn,), jnp.float32)
    x4 = jax.random.normal(k_x4, (2, 64, Dn), dtype=jnp.float32)
    y4 = jax.block_until_ready(layer_norm(x4, gn, bn))
    assert jnp.allclose(y4, _reference(x4, gn, bn), atol=1e-5, rtol=1e-5)

    print("KERNEL_OK")
</pallas_src>

<mosaic_0001>
module attributes {stable_mosaic.version = 11 : i64} {
  func.func @_layernorm_kernel(%arg0: i32, %arg1: memref<512x128xf32, #tpu.memory_space<vmem>>, %arg2: memref<1x128xf32, #tpu.memory_space<vmem>>, %arg3: memref<1x128xf32, #tpu.memory_space<vmem>>, %arg4: memref<512x128xf32, #tpu.memory_space<vmem>>) attributes {dimension_semantics = [#tpu.dimension_semantics<parallel>], iteration_bounds = array<i64: 1>, scalar_prefetch = 0 : i64, scratch_operands = 0 : i64, tpu.core_type = #tpu.core_type<tc>, window_params = [{transform_indices = @transform_0, window_bounds = array<i64: 512, 128>}, {pipeline_mode = #tpu.pipeline_mode<synchronous>, transform_indices = @transform_1, window_bounds = array<i64: 1, 128>}, {pipeline_mode = #tpu.pipeline_mode<synchronous>, transform_indices = @transform_2, window_bounds = array<i64: 1, 128>}, {transform_indices = @transform_3, window_bounds = array<i64: 512, 128>}]} {
    %c0 = arith.constant 0 : index
    %c0_0 = arith.constant 0 : index
    %0 = vector.load %arg1[%c0, %c0_0] : memref<512x128xf32, #tpu.memory_space<vmem>>, vector<512x128xf32>
    %cst = arith.constant dense<0.000000e+00> : vector<512xf32>
    %1 = vector.multi_reduction <add>, %0, %cst [1] : vector<512x128xf32> to vector<512xf32>
    %2 = vector.shape_cast %1 : vector<512xf32> to vector<512x1xf32>
    %cst_1 = arith.constant 7.812500e-03 : f32
    %3 = vector.broadcast %cst_1 : f32 to vector<512x1xf32>
    %4 = arith.mulf %2, %3 : vector<512x1xf32>
    %5 = vector.broadcast %4 : vector<512x1xf32> to vector<512x128xf32>
    %6 = arith.subf %0, %5 : vector<512x128xf32>
    %7 = arith.mulf %6, %6 : vector<512x128xf32>
    %cst_2 = arith.constant dense<0.000000e+00> : vector<512xf32>
    %8 = vector.multi_reduction <add>, %7, %cst_2 [1] : vector<512x128xf32> to vector<512xf32>
    %9 = vector.shape_cast %8 : vector<512xf32> to vector<512x1xf32>
    %cst_3 = arith.constant 7.812500e-03 : f32
    %10 = vector.broadcast %cst_3 : f32 to vector<512x1xf32>
    %11 = arith.mulf %9, %10 : vector<512x1xf32>
    %cst_4 = arith.constant 9.99999974E-6 : f32
    %12 = vector.broadcast %cst_4 : f32 to vector<512x1xf32>
    %13 = arith.addf %11, %12 : vector<512x1xf32>
    %14 = math.rsqrt %13 : vector<512x1xf32>
    %15 = vector.broadcast %14 : vector<512x1xf32> to vector<512x128xf32>
    %16 = arith.mulf %6, %15 : vector<512x128xf32>
    %c0_5 = arith.constant 0 : index
    %c0_6 = arith.constant 0 : index
    %17 = vector.load %arg2[%c0_5, %c0_6] : memref<1x128xf32, #tpu.memory_space<vmem>>, vector<1x128xf32>
    %18 = vector.broadcast %17 : vector<1x128xf32> to vector<512x128xf32>
    %19 = arith.mulf %16, %18 : vector<512x128xf32>
    %c0_7 = arith.constant 0 : index
    %c0_8 = arith.constant 0 : index
    %20 = vector.load %arg3[%c0_7, %c0_8] : memref<1x128xf32, #tpu.memory_space<vmem>>, vector<1x128xf32>
    %21 = vector.broadcast %20 : vector<1x128xf32> to vector<512x128xf32>
    %22 = arith.addf %19, %21 : vector<512x128xf32>
    %c0_9 = arith.constant 0 : index
    %c0_10 = arith.constant 0 : index
    %23 = vector.load %arg4[%c0_9, %c0_10] : memref<512x128xf32, #tpu.memory_space<vmem>>, vector<512x128xf32>
    tpu.vector_store %arg4[%c0_9, %c0_10], %22 {strides = array<i32>} : memref<512x128xf32, #tpu.memory_space<vmem>>, vector<512x128xf32>,
    return
  }
  func.func @transform_0(%arg0: i32) -> (i32, i32) {
    %c0_i32 = arith.constant 0 : i32
    %c0_i32_0 = arith.constant 0 : i32
    return %arg0, %c0_i32 : i32, i32
  }
  func.func @transform_1(%arg0: i32) -> (i32, i32) {
    %c0_i32 = arith.constant 0 : i32
    %c0_i32_0 = arith.constant 0 : i32
    %c0_i32_1 = arith.constant 0 : i32
    return %c0_i32, %c0_i32_0 : i32, i32
  }
  func.func @transform_2(%arg0: i32) -> (i32, i32) {
    %c0_i32 = arith.constant 0 : i32
    %c0_i32_0 = arith.constant 0 : i32
    %c0_i32_1 = arith.constant 0 : i32
    return %c0_i32, %c0_i32_0 : i32, i32
  }
  func.func @transform_3(%arg0: i32) -> (i32, i32) {
    %c0_i32 = arith.constant 0 : i32
    %c0_i32_0 = arith.constant 0 : i32
    return %arg0, %c0_i32 : i32, i32
  }
}

</mosaic_0001>

<bundles_post_ra>
// kernel: tpu_custom_call.1
= control target key start
LH: loop header
LB: loop body
LE: loop exit
PB: predicated region body
PF: predicated region fallthrough
CT: control target
= control target key end

     0   :  { %8 = vsyncpa [#allocation3], 0  ;;  %s1942_s0 = inlined_call_operand.hbm [shape: f32[512,128], index: 0, kind: input, shape index: {}]   ;;  %s1943_s1 = inlined_call_operand.vmem [shape: f32[1,128], index: 1, kind: input, shape index: {}]   ;;  %s1944_s2 = inlined_call_operand.vmem [shape: f32[1,128], index: 2, kind: input, shape index: {}]   ;;  %s1945_s3 = inlined_call_operand.hbm [shape: f32[512,128], index: 3, kind: output, shape index: {}]  }
   0x1   :  { %9 = vsyncpa [#allocation4], 0  ;;  %s1200_s12 = smov [#allocation2]  }
   0x2   :  { %s15_s13 = sshll.u32 %s1200_s12, 4  ;;  %s16_s13 = int_to_ptr.vmem [resolvable:$true] %s15_s13 }
   0x3   :  { %s1164_s14 = scalar_lea.vmem %s16_s13, 8192  ;;  %p1169_p1 = scmp.lt.s32.totalorder %s16_s13, %s16_s13 }
   0x4   :  { %p1165_p0 = scmp.ne.s32.totalorder %s16_s13, %s1164_s14  ;;  %p1170_p2 = scmp.lt.s32.totalorder %s1164_s14, %s1164_s14 }
   0x6   :  { %p1171_p3 = por %p1170_p2, %p1169_p1 }
   0x8   :  { %p1172_p4 = pnand %p1171_p3, %p1165_p0 }
   0xa   :  { %1175 = shalt.err (!%p1172_p4)
}
   0xb   :  { %s1201_s15 = smov 128   ;;  %s1202_s16 = smov 8  }
   0xc   :  { %21 = dma.hbm_to_vmem [thread:$0]  %s1942_s0, 8192, %s16_s13, [#allocation3], %s1201_s15, %s1201_s15, %s1202_s16  }
   0xd   :  { %1196 = dma.done.wait [#allocation3], 8192  }
   0xe   :  { %1197 = vsyncadd [#allocation3], 4294959104  ;;  %v1230_v0 = vld [vmem:[#allocation2] sm:$0xff]  ;;  %v1232_v1 = vld [vmem:[#allocation2 + $0x10] sm:$0xff] }
   0xf   :  { %93 = vadd.xlane.f32.xlu0 %v1230_v0  ;;  %97 = vadd.xlane.f32.xlu1 %v1232_v1  ;;  %v1236_v2 = vld [vmem:[#allocation2 + $0x8] sm:$0xff]  ;;  %v1238_v3 = vld [vmem:[#allocation2 + $0x18] sm:$0xff]  ;;  %v1242_v4 = vld [vmem:[#allocation2 + $0x20] sm:$0xff] }
  0x10   :  { %v1244_v5 = vld [vmem:[#allocation2 + $0x28] sm:$0xff]  ;;  %v1248_v6 = vld [vmem:[#allocation2 + $0x30] sm:$0xff]  ;;  %v1250_v7 = vld [vmem:[#allocation2 + $0x38] sm:$0xff] }
  0x11   :  { %v1254_v8 = vld [vmem:[#allocation2 + $0x40] sm:$0xff]  ;;  %v1256_v9 = vld [vmem:[#allocation2 + $0x48] sm:$0xff]  ;;  %v1260_v10 = vld [vmem:[#allocation2 + $0x50] sm:$0xff] }
  0x12   :  { %v1262_v11 = vld [vmem:[#allocation2 + $0x58] sm:$0xff]  ;;  %v1266_v12 = vld [vmem:[#allocation2 + $0x60] sm:$0xff]  ;;  %v1268_v13 = vld [vmem:[#allocation2 + $0x68] sm:$0xff] }
  0x13   :  { %95 = vadd.xlane.f32.xlu0 %v1236_v2  ;;  %99 = vadd.xlane.f32.xlu1 %v1238_v3  ;;  %v1272_v14 = vld [vmem:[#allocation2 + $0x70] sm:$0xff]  ;;  %v1274_v15 = vld [vmem:[#allocation2 + $0x78] sm:$0xff]  ;;  %v1278_v16 = vld [vmem:[#allocation2 + $0x80] sm:$0xff] }
  0x14   :  { %v1280_v17 = vld [vmem:[#allocation2 + $0x88] sm:$0xff]  ;;  %v1284_v18 = vld [vmem:[#allocation2 + $0x90] sm:$0xff]  ;;  %v1286_v19 = vld [vmem:[#allocation2 + $0x98] sm:$0xff] }
  0x15   :  { %v1290_v20 = vld [vmem:[#allocation2 + $0xa0] sm:$0xff]  ;;  %v1292_v21 = vld [vmem:[#allocation2 + $0xa8] sm:$0xff]  ;;  %v1296_v22 = vld [vmem:[#allocation2 + $0xb0] sm:$0xff] }
  0x16   :  { %v1298_v23 = vld [vmem:[#allocation2 + $0xb8] sm:$0xff]  ;;  %v1302_v24 = vld [vmem:[#allocation2 + $0xc0] sm:$0xff]  ;;  %v1304_v25 = vld [vmem:[#allocation2 + $0xc8] sm:$0xff] }
  0x17   :  { %101 = vadd.xlane.f32.xlu0 %v1242_v4  ;;  %103 = vadd.xlane.f32.xlu1 %v1244_v5  ;;  %v1308_v26 = vld [vmem:[#allocation2 + $0xd0] sm:$0xff]  ;;  %v1310_v27 = vld [vmem:[#allocation2 + $0xd8] sm:$0xff]  ;;  %v1314_v28 = vld [vmem:[#allocation2 + $0xe0] sm:$0xff] }
  0x18   :  { %v1316_v29 = vld [vmem:[#allocation2 + $0xe8] sm:$0xff]  ;;  %v1320_v30 = vld [vmem:[#allocation2 + $0xf0] sm:$0xff]  ;;  %v1322_v31 = vld [vmem:[#allocation2 + $0xf8] sm:$0xff] }
  0x19   :  { %v1326_v32 = vld [vmem:[#allocation2 + $0x100] sm:$0xff]  ;;  %v1328_v33 = vld [vmem:[#allocation2 + $0x108] sm:$0xff]  ;;  %v1332_v34 = vld [vmem:[#allocation2 + $0x110] sm:$0xff] }
  0x1a   :  { %v1334_v35 = vld [vmem:[#allocation2 + $0x118] sm:$0xff]  ;;  %v1338_v36 = vld [vmem:[#allocation2 + $0x120] sm:$0xff]  ;;  %v1340_v37 = vld [vmem:[#allocation2 + $0x128] sm:$0xff] }
  0x1b   :  { %105 = vadd.xlane.f32.xlu0 %v1248_v6  ;;  %107 = vadd.xlane.f32.xlu1 %v1250_v7  ;;  %v1344_v38 = vld [vmem:[#allocation2 + $0x130] sm:$0xff]  ;;  %v1346_v39 = vld [vmem:[#allocation2 + $0x138] sm:$0xff]  ;;  %v1350_v40 = vld [vmem:[#allocation2 + $0x140] sm:$0xff] }
  0x1c   :  { %v1352_v41 = vld [vmem:[#allocation2 + $0x148] sm:$0xff]  ;;  %v1356_v42 = vld [vmem:[#allocation2 + $0x150] sm:$0xff]  ;;  %v1358_v43 = vld [vmem:[#allocation2 + $0x158] sm:$0xff] }
  0x1d   :  { %v1362_v44 = vld [vmem:[#allocation2 + $0x160] sm:$0xff]  ;;  %v1364_v45 = vld [vmem:[#allocation2 + $0x168] sm:$0xff]  ;;  %v1368_v46 = vld [vmem:[#allocation2 + $0x170] sm:$0xff] }
  0x1e   :  { %v1370_v47 = vld [vmem:[#allocation2 + $0x178] sm:$0xff]  ;;  %v1374_v48 = vld [vmem:[#allocation2 + $0x180] sm:$0xff]  ;;  %v1376_v49 = vld [vmem:[#allocation2 + $0x188] sm:$0xff] }
  0x1f   :  { %109 = vadd.xlane.f32.xlu0 %v1254_v8  ;;  %111 = vadd.xlane.f32.xlu1 %v1256_v9  ;;  %v1380_v50 = vld [vmem:[#allocation2 + $0x190] sm:$0xff]  ;;  %v1382_v51 = vld [vmem:[#allocation2 + $0x198] sm:$0xff]  ;;  %v1386_v52 = vld [vmem:[#allocation2 + $0x1a0] sm:$0xff] }
  0x20   :  { %1978 = vst [vmem:[#allocation8_spill] sm:$0xff] %v1382_v51  ;;  %1979 = vst [vmem:[#allocation9_spill] sm:$0xff] %v1386_v52  ;;  %v1388_v53 = vld [vmem:[#allocation2 + $0x1a8] sm:$0xff]  ;;  %v1392_v54 = vld [vmem:[#allocation2 + $0x1b0] sm:$0xff] }
  0x21   :  { %1980 = vst [vmem:[#allocation10_spill] sm:$0xff] %v1388_v53  ;;  %1981 = vst [vmem:[#allocation11_spill] sm:$0xff] %v1392_v54  ;;  %v1394_v55 = vld [vmem:[#allocation2 + $0x1b8] sm:$0xff]  ;;  %v1398_v56 = vld [vmem:[#allocation2 + $0x1c0] sm:$0xff] }
  0x22   :  { %1982 = vst [vmem:[#allocation12_spill] sm:$0xff] %v1394_v55  ;;  %1983 = vst [vmem:[#allocation13_spill] sm:$0xff] %v1398_v56  ;;  %v1400_v57 = vld [vmem:[#allocation2 + $0x1c8] sm:$0xff]  ;;  %v1404_v58 = vld [vmem:[#allocation2 + $0x1d0] sm:$0xff] }
  0x23   :  { %113 = vadd.xlane.f32.xlu0 %v1260_v10  ;;  %115 = vadd.xlane.f32.xlu1 %v1262_v11  ;;  %1984 = vst [vmem:[#allocation14_spill] sm:$0xff] %v1400_v57  ;;  %1985 = vst [vmem:[#allocation15_spill] sm:$0xff] %v1404_v58  ;;  %v1406_v59 = vld [vmem:[#allocation2 + $0x1d8] sm:$0xff]  ;;  %v1410_v60 = vld [vmem:[#allocation2 + $0x1e0] sm:$0xff] }
  0x24   :  { %1986 = vst [vmem:[#allocation16_spill] sm:$0xff] %v1406_v59  ;;  %1987 = vst [vmem:[#allocation17_spill] sm:$0xff] %v1410_v60  ;;  %v1412_v61 = vld [vmem:[#allocation2 + $0x1e8] sm:$0xff]  ;;  %v1416_v62 = vld [vmem:[#allocation2 + $0x1f0] sm:$0xff] }
  0x25   :  { %1988 = vst [vmem:[#allocation18_spill] sm:$0xff] %v1412_v61  ;;  %v1418_v63 = vld [vmem:[#allocation2 + $0x1f8] sm:$0xff] }
  0x26   :  { %1989 = vst [vmem:[#allocation19_spill] sm:$0xff] %v1418_v63 }
  0x27   :  { %117 = vadd.xlane.f32.xlu0 %v1266_v12  ;;  %119 = vadd.xlane.f32.xlu1 %v1268_v13 }
  0x2b   :  { %121 = vadd.xlane.f32.xlu0 %v1272_v14  ;;  %123 = vadd.xlane.f32.xlu1 %v1274_v15 }
  0x2f   :  { %125 = vadd.xlane.f32.xlu0 %v1278_v16  ;;  %127 = vadd.xlane.f32.xlu1 %v1280_v17 }
  0x33   :  { %129 = vadd.xlane.f32.xlu0 %v1284_v18  ;;  %131 = vadd.xlane.f32.xlu1 %v1286_v19 }
  0x37   :  { %133 = vadd.xlane.f32.xlu0 %v1290_v20  ;;  %135 = vadd.xlane.f32.xlu1 %v1292_v21 }
  0x3b   :  { %137 = vadd.xlane.f32.xlu0 %v1296_v22  ;;  %139 = vadd.xlane.f32.xlu1 %v1298_v23 }
  0x3f   :  { %141 = vadd.xlane.f32.xlu0 %v1302_v24  ;;  %143 = vadd.xlane.f32.xlu1 %v1304_v25 }
  0x43   :  { %145 = vadd.xlane.f32.xlu0 %v1308_v26  ;;  %147 = vadd.xlane.f32.xlu1 %v1310_v27 }
  0x47   :  { %149 = vadd.xlane.f32.xlu0 %v1314_v28  ;;  %151 = vadd.xlane.f32.xlu1 %v1316_v29 }
  0x4b   :  { %153 = vadd.xlane.f32.xlu0 %v1320_v30  ;;  %155 = vadd.xlane.f32.xlu1 %v1322_v31 }
  0x4f   :  { %157 = vadd.xlane.f32.xlu0 %v1326_v32  ;;  %159 = vadd.xlane.f32.xlu1 %v1328_v33 }
  0x53   :  { %161 = vadd.xlane.f32.xlu0 %v1332_v34  ;;  %163 = vadd.xlane.f32.xlu1 %v1334_v35 }
  0x57   :  { %165 = vadd.xlane.f32.xlu0 %v1338_v36  ;;  %167 = vadd.xlane.f32.xlu1 %v1340_v37 }
  0x5b   :  { %169 = vadd.xlane.f32.xlu0 %v1344_v38  ;;  %171 = vadd.xlane.f32.xlu1 %v1346_v39 }
  0x5f   :  { %173 = vadd.xlane.f32.xlu0 %v1350_v40  ;;  %175 = vadd.xlane.f32.xlu1 %v1352_v41 }
  0x63   :  { %177 = vadd.xlane.f32.xlu0 %v1356_v42  ;;  %179 = vadd.xlane.f32.xlu1 %v1358_v43 }
  0x67   :  { %181 = vadd.xlane.f32.xlu0 %v1362_v44  ;;  %183 = vadd.xlane.f32.xlu1 %v1364_v45 }
  0x6b   :  { %185 = vadd.xlane.f32.xlu0 %v1368_v46  ;;  %187 = vadd.xlane.f32.xlu1 %v1370_v47 }
  0x6f   :  { %189 = vadd.xlane.f32.xlu0 %v1374_v48  ;;  %191 = vadd.xlane.f32.xlu1 %v1376_v49 }
  0x73   :  { %193 = vadd.xlane.f32.xlu0 %v1380_v50  ;;  %195 = vadd.xlane.f32.xlu1 %v1382_v51 }
  0x77   :  { %197 = vadd.xlane.f32.xlu0 %v1386_v52  ;;  %199 = vadd.xlane.f32.xlu1 %v1388_v53 }
  0x7b   :  { %201 = vadd.xlane.f32.xlu0 %v1392_v54  ;;  %203 = vadd.xlane.f32.xlu1 %v1394_v55 }
  0x7f   :  { %205 = vadd.xlane.f32.xlu0 %v1398_v56  ;;  %207 = vadd.xlane.f32.xlu1 %v1400_v57 }
  0x83   :  { %209 = vadd.xlane.f32.xlu0 %v1404_v58  ;;  %211 = vadd.xlane.f32.xlu1 %v1406_v59 }
  0x87   :  { %213 = vadd.xlane.f32.xlu0 %v1410_v60  ;;  %215 = vadd.xlane.f32.xlu1 %v1412_v61 }
  0x8b   :  { %217 = vadd.xlane.f32.xlu0 %v1416_v62  ;;  %219 = vadd.xlane.f32.xlu1 %v1418_v63 }
  0x98   :  { %v94_v57 = vpop.xlane.xlu0 %93  ;;  %v98_v58 = vpop.xlane.xlu1 %97 }
  0x99   :  { %v221_v56 = vmul.f32 0.0078125, %v94_v57  ;;  %v223_v59 = vmul.f32 0.0078125, %v98_v58 }
  0x9b   :  { %v1423_v55 = vsub.f32 %v1230_v0, %v221_v56  ;;  %v1426_v54 = vsub.f32 %v1232_v1, %v223_v59 }
  0x9c   :  { %v96_v60 = vpop.xlane.xlu0 %95  ;;  %v100_v61 = vpop.xlane.xlu1 %99 }
  0x9d   :  { %1990 = vst [vmem:[#allocation20_spill] sm:$0xff] %v1426_v54  ;;  %v222_v53 = vmul.f32 0.0078125, %v96_v60  ;;  %v349_v52 = vmul.f32 %v1423_v55, %v1423_v55  ;;  %v224_v51 = vmul.f32 0.0078125, %v100_v61  ;;  %v351_v63 = vmul.f32 %v1426_v54, %v1426_v54 }
  0x9f   :  { %413 = vadd.xlane.f32.xlu0 %v349_v52  ;;  %v1433_v57 = vsub.f32 %v1236_v2, %v222_v53  ;;  %v1436_v0 = vsub.f32 %v1238_v3, %v224_v51 }
  0xa0   :  { %v102_v56 = vpop.xlane.xlu0 %101  ;;  %v104_v1 = vpop.xlane.xlu1 %103 }
  0xa1   :  { %v225_v58 = vmul.f32 0.0078125, %v102_v56  ;;  %v350_v59 = vmul.f32 %v1433_v57, %v1433_v57  ;;  %v226_v60 = vmul.f32 0.0078125, %v104_v1  ;;  %v352_v52 = vmul.f32 %v1436_v0, %v1436_v0 }
  0xa3   :  { %417 = vadd.xlane.f32.xlu0 %v351_v63  ;;  %415 = vadd.xlane.f32.xlu1 %v350_v59  ;;  %v1443_v61 = vsub.f32 %v1242_v4, %v225_v58  ;;  %v1446_v2 = vsub.f32 %v1244_v5, %v226_v60 }
  0xa4   :  { %v106_v3 = vpop.xlane.xlu0 %105  ;;  %v108_v51 = vpop.xlane.xlu1 %107 }
  0xa5   :  { %v227_v53 = vmul.f32 0.0078125, %v106_v3  ;;  %v353_v56 = vmul.f32 %v1443_v61, %v1443_v61  ;;  %v228_v54 = vmul.f32 0.0078125, %v108_v51  ;;  %v354_v63 = vmul.f32 %v1446_v2, %v1446_v2 }
  0xa7   :  { %419 = vadd.xlane.f32.xlu1 %v352_v52  ;;  %421 = vadd.xlane.f32.xlu0 %v353_v56  ;;  %v1453_v1 = vsub.f32 %v1248_v6, %v227_v53  ;;  %v1456_v4 = vsub.f32 %v1250_v7, %v228_v54 }
  0xa8   :  { %v110_v5 = vpop.xlane.xlu0 %109  ;;  %v112_v58 = vpop.xlane.xlu1 %111 }
  0xa9   :  { %v229_v59 = vmul.f32 0.0078125, %v110_v5  ;;  %v355_v60 = vmul.f32 %v1453_v1, %v1453_v1  ;;  %v230_v3 = vmul.f32 0.0078125, %v112_v58  ;;  %v356_v52 = vmul.f32 %v1456_v4, %v1456_v4 }
  0xab   :  { %423 = vadd.xlane.f32.xlu1 %v354_v63  ;;  %425 = vadd.xlane.f32.xlu0 %v355_v60  ;;  %v1463_v51 = vsub.f32 %v1254_v8, %v229_v59  ;;  %v1466_v6 = vsub.f32 %v1256_v9, %v230_v3 }
  0xac   :  { %v114_v7 = vpop.xlane.xlu0 %113  ;;  %v116_v54 = vpop.xlane.xlu1 %115 }
  0xad   :  { %v231_v53 = vmul.f32 0.0078125, %v114_v7  ;;  %v357_v56 = vmul.f32 %v1463_v51, %v1463_v51  ;;  %v232_v5 = vmul.f32 0.0078125, %v116_v54  ;;  %v358_v63 = vmul.f32 %v1466_v6, %v1466_v6 }
  0xaf   :  { %427 = vadd.xlane.f32.xlu1 %v356_v52  ;;  %429 = vadd.xlane.f32.xlu0 %v357_v56  ;;  %v1473_v58 = vsub.f32 %v1260_v10, %v231_v53  ;;  %v1476_v8 = vsub.f32 %v1262_v11, %v232_v5 }
  0xb0   :  { %v118_v9 = vpop.xlane.xlu0 %117  ;;  %v120_v59 = vpop.xlane.xlu1 %119 }
  0xb1   :  { %v233_v60 = vmul.f32 0.0078125, %v118_v9  ;;  %v359_v3 = vmul.f32 %v1473_v58, %v1473_v58  ;;  %v234_v7 = vmul.f32 0.0078125, %v120_v59  ;;  %v360_v52 = vmul.f32 %v1476_v8, %v1476_v8 }
  0xb3   :  { %431 = vadd.xlane.f32.xlu1 %v358_v63  ;;  %433 = vadd.xlane.f32.xlu0 %v359_v3  ;;  %v1483_v54 = vsub.f32 %v1266_v12, %v233_v60  ;;  %v1486_v10 = vsub.f32 %v1268_v13, %v234_v7 }
  0xb4   :  { %v122_v11 = vpop.xlane.xlu0 %121  ;;  %v124_v53 = vpop.xlane.xlu1 %123 }
  0xb5   :  { %v235_v56 = vmul.f32 0.0078125, %v122_v11  ;;  %v361_v5 = vmul.f32 %v1483_v54, %v1483_v54  ;;  %v236_v9 = vmul.f32 0.0078125, %v124_v53  ;;  %v362_v63 = vmul.f32 %v1486_v10, %v1486_v10 }
  0xb7   :  { %435 = vadd.xlane.f32.xlu1 %v360_v52  ;;  %437 = vadd.xlane.f32.xlu0 %v361_v5  ;;  %v1493_v59 = vsub.f32 %v1272_v14, %v235_v56  ;;  %v1496_v12 = vsub.f32 %v1274_v15, %v236_v9 }
  0xb8   :  { %v126_v13 = vpop.xlane.xlu0 %125  ;;  %v128_v60 = vpop.xlane.xlu1 %127 }
  0xb9   :  { %v237_v3 = vmul.f32 0.0078125, %v126_v13  ;;  %v363_v7 = vmul.f32 %v1493_v59, %v1493_v59  ;;  %v238_v11 = vmul.f32 0.0078125, %v128_v60  ;;  %v364_v52 = vmul.f32 %v1496_v12, %v1496_v12 }
  0xbb   :  { %439 = vadd.xlane.f32.xlu1 %v362_v63  ;;  %441 = vadd.xlane.f32.xlu0 %v363_v7  ;;  %v1503_v53 = vsub.f32 %v1278_v16, %v237_v3  ;;  %v1506_v14 = vsub.f32 %v1280_v17, %v238_v11 }
  0xbc   :  { %v130_v15 = vpop.xlane.xlu0 %129  ;;  %v132_v56 = vpop.xlane.xlu1 %131 }
  0xbd   :  { %v239_v5 = vmul.f32 0.0078125, %v130_v15  ;;  %v365_v9 = vmul.f32 %v1503_v53, %v1503_v53  ;;  %v240_v13 = vmul.f32 0.0078125, %v132_v56  ;;  %v366_v63 = vmul.f32 %v1506_v14, %v1506_v14 }
  0xbf   :  { %443 = vadd.xlane.f32.xlu1 %v364_v52  ;;  %445 = vadd.xlane.f32.xlu0 %v365_v9  ;;  %v1513_v60 = vsub.f32 %v1284_v18, %v239_v5  ;;  %v1516_v16 = vsub.f32 %v1286_v19, %v240_v13 }
  0xc0   :  { %v134_v17 = vpop.xlane.xlu0 %133  ;;  %v136_v3 = vpop.xlane.xlu1 %135 }
  0xc1   :  { %v241_v7 = vmul.f32 0.0078125, %v134_v17  ;;  %v367_v11 = vmul.f32 %v1513_v60, %v1513_v60  ;;  %v242_v15 = vmul.f32 0.0078125, %v136_v3  ;;  %v368_v52 = vmul.f32 %v1516_v16, %v1516_v16 }
  0xc3   :  { %447 = vadd.xlane.f32.xlu1 %v366_v63  ;;  %449 = vadd.xlane.f32.xlu0 %v367_v11  ;;  %v1523_v56 = vsub.f32 %v1290_v20, %v241_v7  ;;  %v1526_v18 = vsub.f32 %v1292_v21, %v242_v15 }
  0xc4   :  { %v138_v19 = vpop.xlane.xlu0 %137  ;;  %v140_v5 = vpop.xlane.xlu1 %139 }
  0xc5   :  { %v243_v9 = vmul.f32 0.0078125, %v138_v19  ;;  %v369_v13 = vmul.f32 %v1523_v56, %v1523_v56  ;;  %v244_v17 = vmul.f32 0.0078125, %v140_v5  ;;  %v370_v63 = vmul.f32 %v1526_v18, %v1526_v18 }
  0xc7   :  { %451 = vadd.xlane.f32.xlu1 %v368_v52  ;;  %453 = vadd.xlane.f32.xlu0 %v369_v13  ;;  %v1533_v3 = vsub.f32 %v1296_v22, %v243_v9  ;;  %v1536_v20 = vsub.f32 %v1298_v23, %v244_v17 }
  0xc8   :  { %v142_v21 = vpop.xlane.xlu0 %141  ;;  %v144_v7 = vpop.xlane.xlu1 %143 }
  0xc9   :  { %v245_v11 = vmul.f32 0.0078125, %v142_v21  ;;  %v371_v15 = vmul.f32 %v1533_v3, %v1533_v3  ;;  %v246_v19 = vmul.f32 0.0078125, %v144_v7  ;;  %v372_v52 = vmul.f32 %v1536_v20, %v1536_v20 }
  0xcb   :  { %455 = vadd.xlane.f32.xlu1 %v370_v63  ;;  %457 = vadd.xlane.f32.xlu0 %v371_v15  ;;  %v1543_v5 = vsub.f32 %v1302_v24, %v245_v11  ;;  %v1546_v22 = vsub.f32 %v1304_v25, %v246_v19 }
  0xcc   :  { %v146_v23 = vpop.xlane.xlu0 %145  ;;  %v148_v9 = vpop.xlane.xlu1 %147 }
  0xcd   :  { %v247_v13 = vmul.f32 0.0078125, %v146_v23  ;;  %v373_v17 = vmul.f32 %v1543_v5, %v1543_v5  ;;  %v248_v21 = vmul.f32 0.0078125, %v148_v9  ;;  %v374_v63 = vmul.f32 %v1546_v22, %v1546_v22 }
  0xcf   :  { %459 = vadd.xlane.f32.xlu1 %v372_v52  ;;  %461 = vadd.xlane.f32.xlu0 %v373_v17  ;;  %v1553_v7 = vsub.f32 %v1308_v26, %v247_v13  ;;  %v1556_v24 = vsub.f32 %v1310_v27, %v248_v21 }
  0xd0   :  { %v150_v25 = vpop.xlane.xlu0 %149  ;;  %v152_v11 = vpop.xlane.xlu1 %151 }
  0xd1   :  { %v249_v15 = vmul.f32 0.0078125, %v150_v25  ;;  %v375_v19 = vmul.f32 %v1553_v7, %v1553_v7  ;;  %v250_v23 = vmul.f32 0.0078125, %v152_v11  ;;  %v376_v52 = vmul.f32 %v1556_v24, %v1556_v24 }
  0xd3   :  { %463 = vadd.xlane.f32.xlu1 %v374_v63  ;;  %465 = vadd.xlane.f32.xlu0 %v375_v19  ;;  %v1563_v9 = vsub.f32 %v1314_v28, %v249_v15  ;;  %v1566_v26 = vsub.f32 %v1316_v29, %v250_v23 }
  0xd4   :  { %v154_v27 = vpop.xlane.xlu0 %153  ;;  %v156_v13 = vpop.xlane.xlu1 %155 }
  0xd5   :  { %v251_v17 = vmul.f32 0.0078125, %v154_v27  ;;  %v377_v21 = vmul.f32 %v1563_v9, %v1563_v9  ;;  %v252_v25 = vmul.f32 0.0078125, %v156_v13  ;;  %v378_v28 = vmul.f32 %v1566_v26, %v1566_v26 }
  0xd7   :  { %v1571_v11 = vsub.f32 %v1320_v30, %v251_v17  ;;  %467 = vadd.xlane.f32.xlu1 %v376_v52  ;;  %469 = vadd.xlane.f32.xlu0 %v377_v21  ;;  %v1574_v63 = vsub.f32 %v1322_v31, %v252_v25 }
  0xd8   :  { %v158_v29 = vpop.xlane.xlu0 %157  ;;  %v160_v15 = vpop.xlane.xlu1 %159 }
  0xd9   :  { %v253_v19 = vmul.f32 0.0078125, %v158_v29  ;;  %v379_v23 = vmul.f32 %v1571_v11, %v1571_v11  ;;  %v254_v27 = vmul.f32 0.0078125, %v160_v15  ;;  %v380_v31 = vmul.f32 %v1574_v63, %v1574_v63 }
  0xdb   :  { %v1581_v13 = vsub.f32 %v1326_v32, %v253_v19  ;;  %471 = vadd.xlane.f32.xlu1 %v378_v28  ;;  %473 = vadd.xlane.f32.xlu0 %v379_v23  ;;  %v1584_v30 = vsub.f32 %v1328_v33, %v254_v27 }
  0xdc   :  { %v162_v52 = vpop.xlane.xlu0 %161  ;;  %v164_v17 = vpop.xlane.xlu1 %163 }
  0xdd   :  { %v255_v21 = vmul.f32 0.0078125, %v162_v52  ;;  %v381_v25 = vmul.f32 %v1581_v13, %v1581_v13  ;;  %v256_v29 = vmul.f32 0.0078125, %v164_v17  ;;  %v382_v33 = vmul.f32 %v1584_v30, %v1584_v30 }
  0xdf   :  { %v1591_v15 = vsub.f32 %v1332_v34, %v255_v21  ;;  %475 = vadd.xlane.f32.xlu1 %v380_v31  ;;  %477 = vadd.xlane.f32.xlu0 %v381_v25  ;;  %v1594_v32 = vsub.f32 %v1334_v35, %v256_v29 }
  0xe0   :  { %v166_v28 = vpop.xlane.xlu0 %165  ;;  %v168_v19 = vpop.xlane.xlu1 %167 }
  0xe1   :  { %v257_v23 = vmul.f32 0.0078125, %v166_v28  ;;  %v383_v27 = vmul.f32 %v1591_v15, %v1591_v15  ;;  %v258_v52 = vmul.f32 0.0078125, %v168_v19  ;;  %v384_v35 = vmul.f32 %v1594_v32, %v1594_v32 }
  0xe3   :  { %v1601_v17 = vsub.f32 %v1338_v36, %v257_v23  ;;  %479 = vadd.xlane.f32.xlu1 %v382_v33  ;;  %481 = vadd.xlane.f32.xlu0 %v383_v27  ;;  %v1604_v34 = vsub.f32 %v1340_v37, %v258_v52 }
  0xe4   :  { %v170_v31 = vpop.xlane.xlu0 %169  ;;  %v172_v21 = vpop.xlane.xlu1 %171 }
  0xe5   :  { %v259_v25 = vmul.f32 0.0078125, %v170_v31  ;;  %v385_v29 = vmul.f32 %v1601_v17, %v1601_v17  ;;  %v260_v28 = vmul.f32 0.0078125, %v172_v21  ;;  %v386_v37 = vmul.f32 %v1604_v34, %v1604_v34 }
  0xe7   :  { %v1611_v19 = vsub.f32 %v1344_v38, %v259_v25  ;;  %483 = vadd.xlane.f32.xlu1 %v384_v35  ;;  %485 = vadd.xlane.f32.xlu0 %v385_v29  ;;  %v1614_v36 = vsub.f32 %v1346_v39, %v260_v28 }
  0xe8   :  { %v174_v33 = vpop.xlane.xlu0 %173  ;;  %v176_v23 = vpop.xlane.xlu1 %175 }
  0xe9   :  { %v261_v27 = vmul.f32 0.0078125, %v174_v33  ;;  %v387_v52 = vmul.f32 %v1611_v19, %v1611_v19  ;;  %v262_v31 = vmul.f32 0.0078125, %v176_v23  ;;  %v388_v39 = vmul.f32 %v1614_v36, %v1614_v36 }
  0xeb   :  { %v1621_v21 = vsub.f32 %v1350_v40, %v261_v27  ;;  %487 = vadd.xlane.f32.xlu1 %v386_v37  ;;  %489 = vadd.xlane.f32.xlu0 %v387_v52  ;;  %v1624_v38 = vsub.f32 %v1352_v41, %v262_v31 }
  0xec   :  { %v178_v35 = vpop.xlane.xlu0 %177  ;;  %v180_v25 = vpop.xlane.xlu1 %179 }
  0xed   :  { %v263_v29 = vmul.f32 0.0078125, %v178_v35  ;;  %v389_v28 = vmul.f32 %v1621_v21, %v1621_v21  ;;  %v264_v33 = vmul.f32 0.0078125, %v180_v25  ;;  %v390_v41 = vmul.f32 %v1624_v38, %v1624_v38 }
  0xef   :  { %v1631_v23 = vsub.f32 %v1356_v42, %v263_v29  ;;  %491 = vadd.xlane.f32.xlu1 %v388_v39  ;;  %493 = vadd.xlane.f32.xlu0 %v389_v28  ;;  %v1634_v40 = vsub.f32 %v1358_v43, %v264_v33 }
  0xf0   :  { %v182_v37 = vpop.xlane.xlu0 %181  ;;  %v184_v27 = vpop.xlane.xlu1 %183 }
  0xf1   :  { %v265_v52 = vmul.f32 0.0078125, %v182_v37  ;;  %v391_v31 = vmul.f32 %v1631_v23, %v1631_v23  ;;  %v266_v35 = vmul.f32 0.0078125, %v184_v27  ;;  %v392_v43 = vmul.f32 %v1634_v40, %v1634_v40 }
  0xf3   :  { %v1641_v25 = vsub.f32 %v1362_v44, %v265_v52  ;;  %495 = vadd.xlane.f32.xlu1 %v390_v41  ;;  %497 = vadd.xlane.f32.xlu0 %v391_v31  ;;  %v1644_v42 = vsub.f32 %v1364_v45, %v266_v35 }
  0xf4   :  { %v186_v39 = vpop.xlane.xlu0 %185  ;;  %v188_v29 = vpop.xlane.xlu1 %187 }
  0xf5   :  { %1991 = vst [vmem:[#allocation21_spill] sm:$0xff] %v1644_v42  ;;  %v267_v28 = vmul.f32 0.0078125, %v186_v39  ;;  %v393_v33 = vmul.f32 %v1641_v25, %v1641_v25  ;;  %v268_v37 = vmul.f32 0.0078125, %v188_v29  ;;  %v394_v45 = vmul.f32 %v1644_v42, %v1644_v42 }
  0xf7   :  { %v1651_v27 = vsub.f32 %v1368_v46, %v267_v28  ;;  %499 = vadd.xlane.f32.xlu1 %v392_v43  ;;  %501 = vadd.xlane.f32.xlu0 %v393_v33  ;;  %v1654_v44 = vsub.f32 %v1370_v47, %v268_v37 }
  0xf8   :  { %v190_v41 = vpop.xlane.xlu0 %189  ;;  %v192_v52 = vpop.xlane.xlu1 %191 }
  0xf9   :  { %1992 = vst [vmem:[#allocation22_spill] sm:$0xff] %v1651_v27  ;;  %1993 = vst [vmem:[#allocation23_spill] sm:$0xff] %v1654_v44  ;;  %v269_v31 = vmul.f32 0.0078125, %v190_v41  ;;  %v395_v35 = vmul.f32 %v1651_v27, %v1651_v27  ;;  %v270_v39 = vmul.f32 0.0078125, %v192_v52  ;;  %v396_v47 = vmul.f32 %v1654_v44, %v1654_v44 }
  0xfb   :  { %v1661_v29 = vsub.f32 %v1374_v48, %v269_v31  ;;  %503 = vadd.xlane.f32.xlu1 %v394_v45  ;;  %505 = vadd.xlane.f32.xlu0 %v395_v35  ;;  %v1664_v46 = vsub.f32 %v1376_v49, %v270_v39  ;;  %v1997_v48 = vld [vmem:[#allocation8_spill] sm:$0xff] }
  0xfc   :  { %v194_v43 = vpop.xlane.xlu0 %193  ;;  %v196_v28 = vpop.xlane.xlu1 %195 }
  0xfd   :  { %1994 = vst [vmem:[#allocation24_spill] sm:$0xff] %v1661_v29  ;;  %1995 = vst [vmem:[#allocation25_spill] sm:$0xff] %v1664_v46  ;;  %v271_v33 = vmul.f32 0.0078125, %v194_v43  ;;  %v397_v37 = vmul.f32 %v1661_v29, %v1661_v29  ;;  %v272_v41 = vmul.f32 0.0078125, %v196_v28  ;;  %v398_v49 = vmul.f32 %v1664_v46, %v1664_v46  ;;  %v1999_v29 = vld [vmem:[#allocation9_spill] sm:$0xff] }
  0xff   :  { %v1671_v52 = vsub.f32 %v1380_v50, %v271_v33  ;;  %507 = vadd.xlane.f32.xlu1 %v396_v47  ;;  %509 = vadd.xlane.f32.xlu0 %v397_v37  ;;  %v1674_v45 = vsub.f32 %v1997_v48, %v272_v41  ;;  %v2001_v50 = vld [vmem:[#allocation10_spill] sm:$0xff] }
 0x100   :  { %v198_v31 = vpop.xlane.xlu0 %197  ;;  %v200_v35 = vpop.xlane.xlu1 %199 }
 0x101   :  { %1996 = vst [vmem:[#allocation26_spill] sm:$0xff] %v1671_v52  ;;  %1998 = vst [vmem:[#allocation8_spill] sm:$0xff] %v1674_v45  ;;  %v273_v39 = vmul.f32 0.0078125, %v198_v31  ;;  %v399_v43 = vmul.f32 %v1671_v52, %v1671_v52  ;;  %v274_v44 = vmul.f32 0.0078125, %v200_v35  ;;  %v400_v33 = vmul.f32 %v1674_v45, %v1674_v45  ;;  %v2003_v52 = vld [vmem:[#allocation11_spill] sm:$0xff] }
 0x103   :  { %v1681_v28 = vsub.f32 %v1999_v29, %v273_v39  ;;  %511 = vadd.xlane.f32.xlu1 %v398_v49  ;;  %513 = vadd.xlane.f32.xlu0 %v399_v43  ;;  %v1684_v47 = vsub.f32 %v2001_v50, %v274_v44  ;;  %v2005_v29 = vld [vmem:[#allocation12_spill] sm:$0xff] }
 0x104   :  { %v202_v37 = vpop.xlane.xlu0 %201  ;;  %v204_v41 = vpop.xlane.xlu1 %203 }
 0x105   :  { %2000 = vst [vmem:[#allocation9_spill] sm:$0xff] %v1681_v28  ;;  %2002 = vst [vmem:[#allocation10_spill] sm:$0xff] %v1684_v47  ;;  %v275_v48 = vmul.f32 0.0078125, %v202_v37  ;;  %v401_v31 = vmul.f32 %v1681_v28, %v1681_v28  ;;  %v276_v46 = vmul.f32 0.0078125, %v204_v41  ;;  %v402_v44 = vmul.f32 %v1684_v47, %v1684_v47  ;;  %v2007_v28 = vld [vmem:[#allocation13_spill] sm:$0xff] }
 0x107   :  { %v1691_v35 = vsub.f32 %v2003_v52, %v275_v48  ;;  %515 = vadd.xlane.f32.xlu1 %v400_v33  ;;  %517 = vadd.xlane.f32.xlu0 %v401_v31  ;;  %v1694_v49 = vsub.f32 %v2005_v29, %v276_v46  ;;  %v2009_v52 = vld [vmem:[#allocation14_spill] sm:$0xff] }
 0x108   :  { %v206_v39 = vpop.xlane.xlu0 %205  ;;  %v208_v43 = vpop.xlane.xlu1 %207 }
 0x109   :  { %2004 = vst [vmem:[#allocation11_spill] sm:$0xff] %v1691_v35  ;;  %2006 = vst [vmem:[#allocation12_spill] sm:$0xff] %v1694_v49  ;;  %v277_v50 = vmul.f32 0.0078125, %v206_v39  ;;  %v403_v37 = vmul.f32 %v1691_v35, %v1691_v35  ;;  %v278_v45 = vmul.f32 0.0078125, %v208_v43  ;;  %v404_v46 = vmul.f32 %v1694_v49, %v1694_v49  ;;  %v2011_v35 = vld [vmem:[#allocation15_spill] sm:$0xff] }
 0x10b   :  { %v1701_v41 = vsub.f32 %v2007_v28, %v277_v50  ;;  %519 = vadd.xlane.f32.xlu1 %v402_v44  ;;  %521 = vadd.xlane.f32.xlu0 %v403_v37  ;;  %v1704_v33 = vsub.f32 %v2009_v52, %v278_v45  ;;  %v2013_v28 = vld [vmem:[#allocation16_spill] sm:$0xff] }
 0x10c   :  { %v210_v48 = vpop.xlane.xlu0 %209  ;;  %v212_v31 = vpop.xlane.xlu1 %211 }
 0x10d   :  { %2008 = vst [vmem:[#allocation13_spill] sm:$0xff] %v1701_v41  ;;  %2010 = vst [vmem:[#allocation14_spill] sm:$0xff] %v1704_v33  ;;  %v279_v29 = vmul.f32 0.0078125, %v210_v48  ;;  %v405_v39 = vmul.f32 %v1701_v41, %v1701_v41  ;;  %v280_v47 = vmul.f32 0.0078125, %v212_v31  ;;  %v406_v45 = vmul.f32 %v1704_v33, %v1704_v33  ;;  %v2015_v41 = vld [vmem:[#allocation17_spill] sm:$0xff] }
 0x10f   :  { %v1711_v43 = vsub.f32 %v2011_v35, %v279_v29  ;;  %523 = vadd.xlane.f32.xlu1 %v404_v46  ;;  %525 = vadd.xlane.f32.xlu0 %v405_v39  ;;  %v1714_v44 = vsub.f32 %v2013_v28, %v280_v47  ;;  %v2017_v35 = vld [vmem:[#allocation18_spill] sm:$0xff] }
 0x110   :  { %v214_v50 = vpop.xlane.xlu0 %213  ;;  %v216_v37 = vpop.xlane.xlu1 %215 }
 0x111   :  { %2012 = vst [vmem:[#allocation15_spill] sm:$0xff] %v1711_v43  ;;  %2014 = vst [vmem:[#allocation16_spill] sm:$0xff] %v1714_v44  ;;  %v281_v52 = vmul.f32 0.0078125, %v214_v50  ;;  %v407_v48 = vmul.f32 %v1711_v43, %v1711_v43  ;;  %v282_v49 = vmul.f32 0.0078125, %v216_v37  ;;  %v408_v47 = vmul.f32 %v1714_v44, %v1714_v44 }
 0x113   :  { %v1721_v31 = vsub.f32 %v2015_v41, %v281_v52  ;;  %527 = vadd.xlane.f32.xlu1 %v406_v45  ;;  %529 = vadd.xlane.f32.xlu0 %v407_v48  ;;  %v1724_v46 = vsub.f32 %v2017_v35, %v282_v49  ;;  %v2020_v41 = vld [vmem:[#allocation19_spill] sm:$0xff] }
 0x114   :  { %v218_v29 = vpop.xlane.xlu0 %217  ;;  %v220_v39 = vpop.xlane.xlu1 %219 }
 0x115   :  { %2016 = vst [vmem:[#allocation17_spill] sm:$0xff] %v1721_v31  ;;  %2018 = vst [vmem:[#allocation18_spill] sm:$0xff] %v1724_v46  ;;  %v283_v28 = vmul.f32 0.0078125, %v218_v29  ;;  %v409_v50 = vmul.f32 %v1721_v31, %v1721_v31  ;;  %v284_v33 = vmul.f32 0.0078125, %v220_v39  ;;  %v410_v49 = vmul.f32 %v1724_v46, %v1724_v46 }
 0x117   :  { %v1731_v37 = vsub.f32 %v1416_v62, %v283_v28  ;;  %531 = vadd.xlane.f32.xlu1 %v408_v47  ;;  %533 = vadd.xlane.f32.xlu0 %v409_v50  ;;  %v1734_v45 = vsub.f32 %v2020_v41, %v284_v33 }
 0x119   :  { %2019 = vst [vmem:[#allocation27_spill] sm:$0xff] %v1731_v37  ;;  %2021 = vst [vmem:[#allocation19_spill] sm:$0xff] %v1734_v45  ;;  %v411_v52 = vmul.f32 %v1731_v37, %v1731_v37  ;;  %v412_v48 = vmul.f32 %v1734_v45, %v1734_v45 }
 0x11b   :  { %535 = vadd.xlane.f32.xlu1 %v410_v49  ;;  %537 = vadd.xlane.f32.xlu0 %v411_v52 }
 0x11f   :  { %539 = vadd.xlane.f32.xlu1 %v412_v48 }
 0x128   :  { %v414_v35 = vpop.xlane.xlu0 %413 }
 0x129   :  { %v541_v62 = vmul.f32 0.0078125, %v414_v35 }
 0x12b   :  { %v605_v29 = vadd.f32 1e-05, %v541_v62 }
 0x12c   :  { %v416_v47 = vpop.xlane.xlu1 %415  ;;  %v418_v39 = vpop.xlane.xlu0 %417 }
 0x12d   :  { %1026 = vrsqrt.f32 %v605_v29  ;;  %v542_v33 = vmul.f32 0.0078125, %v416_v47  ;;  %v543_v28 = vmul.f32 0.0078125, %v418_v39 }
 0x12f   :  { %v606_v50 = vadd.f32 1e-05, %v542_v33  ;;  %v607_v41 = vadd.f32 1e-05, %v543_v28 }
 0x130   :  { %v420_v46 = vpop.xlane.xlu1 %419  ;;  %v422_v31 = vpop.xlane.xlu0 %421 }
 0x131   :  { %1028 = vrsqrt.f32 %v606_v50  ;;  %v544_v37 = vmul.f32 0.0078125, %v420_v46  ;;  %v545_v49 = vmul.f32 0.0078125, %v422_v31  ;;  %v1745_v31 = vld [vmem:[%s1943_s1] ss:$0 sm:$0xff] }
 0x132   :  { %1030 = vrsqrt.f32 %v607_v41 }
 0x133   :  { %v608_v52 = vadd.f32 1e-05, %v544_v37  ;;  %v609_v44 = vadd.f32 1e-05, %v545_v49 }
 0x134   :  { %v424_v45 = vpop.xlane.xlu1 %423  ;;  %v426_v48 = vpop.xlane.xlu0 %425 }
 0x135   :  { %1032 = vrsqrt.f32 %v608_v52  ;;  %v546_v35 = vmul.f32 0.0078125, %v424_v45  ;;  %v547_v62 = vmul.f32 0.0078125, %v426_v48 }
 0x136   :  { %1034 = vrsqrt.f32 %v609_v44  ;;  %v1751_v44 = vld [vmem:[%s1944_s2] ss:$0 sm:$0xff] }
 0x137   :  { %v610_v43 = vadd.f32 1e-05, %v546_v35  ;;  %v611_v29 = vadd.f32 1e-05, %v547_v62 }
 0x138   :  { %v428_v47 = vpop.xlane.xlu1 %427  ;;  %v430_v39 = vpop.xlane.xlu0 %429 }
 0x139   :  { %1036 = vrsqrt.f32 %v610_v43  ;;  %v548_v33 = vmul.f32 0.0078125, %v428_v47  ;;  %v549_v28 = vmul.f32 0.0078125, %v430_v39  ;;  %v2022_v47 = vld [vmem:[#allocation20_spill] sm:$0xff] }
 0x13a   :  { %v1027_v27 = vpop.eup %1026  ;;  %1038 = vrsqrt.f32 %v611_v29 }
 0x13b   :  { %v733_v46 = vmul.f32 %v1027_v27, %v1423_v55  ;;  %v612_v37 = vadd.f32 1e-05, %v548_v33  ;;  %v613_v45 = vadd.f32 1e-05, %v549_v28 }
 0x13c   :  { %v432_v50 = vpop.xlane.xlu1 %431  ;;  %v434_v43 = vpop.xlane.xlu0 %433 }
 0x13d   :  { %v804_v41 = vmul.f32 %v1745_v31, %v733_v46  ;;  %1040 = vrsqrt.f32 %v612_v37  ;;  %v550_v49 = vmul.f32 0.0078125, %v432_v50  ;;  %v551_v52 = vmul.f32 0.0078125, %v434_v43 }
 0x13e   :  { %v1029_v48 = vpop.eup %1028  ;;  %1042 = vrsqrt.f32 %v613_v45 }
 0x13f   :  { %v1031_v35 = vpop.eup %1030  ;;  %v875_v62 = vadd.f32 %v1751_v44, %v804_v41  ;;  %v734_v55 = vmul.f32 %v1029_v48, %v1433_v57  ;;  %v614_v27 = vadd.f32 1e-05, %v550_v49  ;;  %v615_v29 = vadd.f32 1e-05, %v551_v52 }
 0x140   :  { %v735_v39 = vmul.f32 %v1031_v35, %v2022_v47  ;;  %v436_v33 = vpop.xlane.xlu1 %435  ;;  %v438_v28 = vpop.xlane.xlu0 %437 }
 0x141   :  { %939 = vst [vmem:[#allocation5] sm:$0xff] %v875_v62  ;;  %v805_v42 = vmul.f32 %v1745_v31, %v734_v55  ;;  %1044 = vrsqrt.f32 %v614_v27  ;;  %v552_v46 = vmul.f32 0.0078125, %v436_v33  ;;  %v553_v37 = vmul.f32 0.0078125, %v438_v28 }
 0x142   :  { %v1033_v50 = vpop.eup %1032  ;;  %v806_v45 = vmul.f32 %v1745_v31, %v735_v39  ;;  %1046 = vrsqrt.f32 %v615_v29 }
 0x143   :  { %v1035_v43 = vpop.eup %1034  ;;  %v876_v41 = vadd.f32 %v1751_v44, %v805_v42  ;;  %v736_v57 = vmul.f32 %v1033_v50, %v1436_v0  ;;  %v616_v49 = vadd.f32 1e-05, %v552_v46  ;;  %v617_v52 = vadd.f32 1e-05, %v553_v37 }
 0x144   :  { %v877_v48 = vadd.f32 %v1751_v44, %v806_v45  ;;  %v737_v35 = vmul.f32 %v1035_v43, %v1443_v61  ;;  %v440_v62 = vpop.xlane.xlu1 %439  ;;  %v442_v55 = vpop.xlane.xlu0 %441 }
 0x145   :  { %940 = vst [vmem:[#allocation5 + $0x8] sm:$0xff] %v876_v41  ;;  %v807_v27 = vmul.f32 %v1745_v31, %v736_v57  ;;  %1048 = vrsqrt.f32 %v616_v49  ;;  %v554_v47 = vmul.f32 0.0078125, %v440_v62  ;;  %v555_v39 = vmul.f32 0.0078125, %v442_v55 }
 0x146   :  { %v1037_v29 = vpop.eup %1036  ;;  %941 = vst [vmem:[#allocation5 + $0x10] sm:$0xff] %v877_v48  ;;  %v808_v42 = vmul.f32 %v1745_v31, %v737_v35  ;;  %1050 = vrsqrt.f32 %v617_v52 }
 0x147   :  { %v1039_v0 = vpop.eup %1038  ;;  %v878_v33 = vadd.f32 %v1751_v44, %v807_v27  ;;  %v738_v28 = vmul.f32 %v1037_v29, %v1446_v2  ;;  %v618_v46 = vadd.f32 1e-05, %v554_v47  ;;  %v619_v61 = vadd.f32 1e-05, %v555_v39 }
 0x148   :  { %v879_v37 = vadd.f32 %v1751_v44, %v808_v42  ;;  %v739_v50 = vmul.f32 %v1039_v0, %v1453_v1  ;;  %v444_v45 = vpop.xlane.xlu1 %443  ;;  %v446_v43 = vpop.xlane.xlu0 %445 }
 0x149   :  { %942 = vst [vmem:[#allocation5 + $0x18] sm:$0xff] %v878_v33  ;;  %v809_v41 = vmul.f32 %v1745_v31, %v738_v28  ;;  %1052 = vrsqrt.f32 %v618_v46  ;;  %v556_v57 = vmul.f32 0.0078125, %v444_v45  ;;  %v557_v49 = vmul.f32 0.0078125, %v446_v43 }
 0x14a   :  { %v1041_v52 = vpop.eup %1040  ;;  %943 = vst [vmem:[#allocation5 + $0x20] sm:$0xff] %v879_v37  ;;  %v810_v48 = vmul.f32 %v1745_v31, %v739_v50  ;;  %1054 = vrsqrt.f32 %v619_v61 }
 0x14b   :  { %v1043_v2 = vpop.eup %1042  ;;  %v880_v35 = vadd.f32 %v1751_v44, %v809_v41  ;;  %v740_v62 = vmul.f32 %v1041_v52, %v1456_v4  ;;  %v620_v55 = vadd.f32 1e-05, %v556_v57  ;;  %v621_v1 = vadd.f32 1e-05, %v557_v49 }
 0x14c   :  { %v881_v27 = vadd.f32 %v1751_v44, %v810_v48  ;;  %v741_v47 = vmul.f32 %v1043_v2, %v1463_v51  ;;  %v448_v39 = vpop.xlane.xlu1 %447  ;;  %v450_v29 = vpop.xlane.xlu0 %449 }
 0x14d   :  { %944 = vst [vmem:[#allocation5 + $0x28] sm:$0xff] %v880_v35  ;;  %v811_v42 = vmul.f32 %v1745_v31, %v740_v62  ;;  %1056 = vrsqrt.f32 %v620_v55  ;;  %v558_v0 = vmul.f32 0.0078125, %v448_v39  ;;  %v559_v33 = vmul.f32 0.0078125, %v450_v29 }
 0x14e   :  { %v1045_v28 = vpop.eup %1044  ;;  %945 = vst [vmem:[#allocation5 + $0x30] sm:$0xff] %v881_v27  ;;  %v812_v46 = vmul.f32 %v1745_v31, %v741_v47  ;;  %1058 = vrsqrt.f32 %v621_v1 }
 0x14f   :  { %v1047_v4 = vpop.eup %1046  ;;  %v882_v61 = vadd.f32 %v1751_v44, %v811_v42  ;;  %v742_v37 = vmul.f32 %v1045_v28, %v1466_v6  ;;  %v622_v50 = vadd.f32 1e-05, %v558_v0  ;;  %v623_v51 = vadd.f32 1e-05, %v559_v33 }
 0x150   :  { %v883_v45 = vadd.f32 %v1751_v44, %v812_v46  ;;  %v743_v43 = vmul.f32 %v1047_v4, %v1473_v58  ;;  %v452_v41 = vpop.xlane.xlu1 %451  ;;  %v454_v57 = vpop.xlane.xlu0 %453 }
 0x151   :  { %946 = vst [vmem:[#allocation5 + $0x38] sm:$0xff] %v882_v61  ;;  %v813_v49 = vmul.f32 %v1745_v31, %v742_v37  ;;  %1060 = vrsqrt.f32 %v622_v50  ;;  %v560_v52 = vmul.f32 0.0078125, %v452_v41  ;;  %v561_v48 = vmul.f32 0.0078125, %v454_v57 }
 0x152   :  { %v1049_v2 = vpop.eup %1048  ;;  %947 = vst [vmem:[#allocation5 + $0x40] sm:$0xff] %v883_v45  ;;  %v814_v35 = vmul.f32 %v1745_v31, %v743_v43  ;;  %1062 = vrsqrt.f32 %v623_v51 }
 0x153   :  { %v1051_v6 = vpop.eup %1050  ;;  %v884_v62 = vadd.f32 %v1751_v44, %v813_v49  ;;  %v744_v55 = vmul.f32 %v1049_v2, %v1476_v8  ;;  %v624_v1 = vadd.f32 1e-05, %v560_v52  ;;  %v625_v58 = vadd.f32 1e-05, %v561_v48 }
 0x154   :  { %v885_v27 = vadd.f32 %v1751_v44, %v814_v35  ;;  %v745_v47 = vmul.f32 %v1051_v6, %v1483_v54  ;;  %v456_v39 = vpop.xlane.xlu1 %455  ;;  %v458_v29 = vpop.xlane.xlu0 %457 }
 0x155   :  { %948 = vst [vmem:[#allocation5 + $0x48] sm:$0xff] %v884_v62  ;;  %v815_v42 = vmul.f32 %v1745_v31, %v744_v55  ;;  %1064 = vrsqrt.f32 %v624_v1  ;;  %v562_v0 = vmul.f32 0.0078125, %v456_v39  ;;  %v563_v33 = vmul.f32 0.0078125, %v458_v29 }
 0x156   :  { %v1053_v28 = vpop.eup %1052  ;;  %949 = vst [vmem:[#allocation5 + $0x50] sm:$0xff] %v885_v27  ;;  %v816_v46 = vmul.f32 %v1745_v31, %v745_v47  ;;  %1066 = vrsqrt.f32 %v625_v58 }
 0x157   :  { %v1055_v8 = vpop.eup %1054  ;;  %v886_v4 = vadd.f32 %v1751_v44, %v815_v42  ;;  %v746_v61 = vmul.f32 %v1053_v28, %v1486_v10  ;;  %v626_v37 = vadd.f32 1e-05, %v562_v0  ;;  %v627_v54 = vadd.f32 1e-05, %v563_v33 }
 0x158   :  { %v887_v50 = vadd.f32 %v1751_v44, %v816_v46  ;;  %v747_v51 = vmul.f32 %v1055_v8, %v1493_v59  ;;  %v460_v45 = vpop.xlane.xlu1 %459  ;;  %v462_v43 = vpop.xlane.xlu0 %461 }
 0x159   :  { %950 = vst [vmem:[#allocation5 + $0x58] sm:$0xff] %v886_v4  ;;  %v817_v41 = vmul.f32 %v1745_v31, %v746_v61  ;;  %1068 = vrsqrt.f32 %v626_v37  ;;  %v564_v57 = vmul.f32 0.0078125, %v460_v45  ;;  %v565_v49 = vmul.f32 0.0078125, %v462_v43 }
 0x15a   :  { %v1057_v52 = vpop.eup %1056  ;;  %951 = vst [vmem:[#allocation5 + $0x60] sm:$0xff] %v887_v50  ;;  %v818_v48 = vmul.f32 %v1745_v31, %v747_v51  ;;  %1070 = vrsqrt.f32 %v627_v54 }
 0x15b   :  { %v1059_v10 = vpop.eup %1058  ;;  %v888_v2 = vadd.f32 %v1751_v44, %v817_v41  ;;  %v748_v35 = vmul.f32 %v1057_v52, %v1496_v12  ;;  %v628_v6 = vadd.f32 1e-05, %v564_v57  ;;  %v629_v59 = vadd.f32 1e-05, %v565_v49 }
 0x15c   :  { %v889_v62 = vadd.f32 %v1751_v44, %v818_v48  ;;  %v749_v55 = vmul.f32 %v1059_v10, %v1503_v53  ;;  %v464_v1 = vpop.xlane.xlu1 %463  ;;  %v466_v58 = vpop.xlane.xlu0 %465 }
 0x15d   :  { %952 = vst [vmem:[#allocation5 + $0x68] sm:$0xff] %v888_v2  ;;  %v819_v27 = vmul.f32 %v1745_v31, %v748_v35  ;;  %1072 = vrsqrt.f32 %v628_v6  ;;  %v566_v47 = vmul.f32 0.0078125, %v464_v1  ;;  %v567_v39 = vmul.f32 0.0078125, %v466_v58 }
 0x15e   :  { %v1061_v29 = vpop.eup %1060  ;;  %953 = vst [vmem:[#allocation5 + $0x70] sm:$0xff] %v889_v62  ;;  %v820_v42 = vmul.f32 %v1745_v31, %v749_v55  ;;  %1074 = vrsqrt.f32 %v629_v59 }
 0x15f   :  { %v1063_v12 = vpop.eup %1062  ;;  %v890_v0 = vadd.f32 %v1751_v44, %v819_v27  ;;  %v750_v33 = vmul.f32 %v1061_v29, %v1506_v14  ;;  %v630_v28 = vadd.f32 1e-05, %v566_v47  ;;  %v631_v53 = vadd.f32 1e-05, %v567_v39 }
 0x160   :  { %v891_v46 = vadd.f32 %v1751_v44, %v820_v42  ;;  %v751_v8 = vmul.f32 %v1063_v12, %v1513_v60  ;;  %v468_v4 = vpop.xlane.xlu1 %467  ;;  %v470_v61 = vpop.xlane.xlu0 %469 }
 0x161   :  { %954 = vst [vmem:[#allocation5 + $0x78] sm:$0xff] %v890_v0  ;;  %v821_v37 = vmul.f32 %v1745_v31, %v750_v33  ;;  %1076 = vrsqrt.f32 %v630_v28  ;;  %v568_v54 = vmul.f32 0.0078125, %v468_v4  ;;  %v569_v50 = vmul.f32 0.0078125, %v470_v61 }
 0x162   :  { %v1065_v51 = vpop.eup %1064  ;;  %955 = vst [vmem:[#allocation5 + $0x80] sm:$0xff] %v891_v46  ;;  %v822_v45 = vmul.f32 %v1745_v31, %v751_v8  ;;  %1078 = vrsqrt.f32 %v631_v53 }
 0x163   :  { %v1067_v14 = vpop.eup %1066  ;;  %v892_v43 = vadd.f32 %v1751_v44, %v821_v37  ;;  %v752_v41 = vmul.f32 %v1065_v51, %v1516_v16  ;;  %v632_v57 = vadd.f32 1e-05, %v568_v54  ;;  %v633_v60 = vadd.f32 1e-05, %v569_v50 }
 0x164   :  { %v893_v49 = vadd.f32 %v1751_v44, %v822_v45  ;;  %v753_v52 = vmul.f32 %v1067_v14, %v1523_v56  ;;  %v472_v48 = vpop.xlane.xlu1 %471  ;;  %v474_v10 = vpop.xlane.xlu0 %473 }
 0x165   :  { %956 = vst [vmem:[#allocation5 + $0x88] sm:$0xff] %v892_v43  ;;  %v823_v2 = vmul.f32 %v1745_v31, %v752_v41  ;;  %1080 = vrsqrt.f32 %v632_v57  ;;  %v570_v35 = vmul.f32 0.0078125, %v472_v48  ;;  %v571_v6 = vmul.f32 0.0078125, %v474_v10 }
 0x166   :  { %v1069_v59 = vpop.eup %1068  ;;  %957 = vst [vmem:[#allocation5 + $0x90] sm:$0xff] %v893_v49  ;;  %v824_v62 = vmul.f32 %v1745_v31, %v753_v52  ;;  %1082 = vrsqrt.f32 %v633_v60 }
 0x167   :  { %v1071_v16 = vpop.eup %1070  ;;  %v894_v55 = vadd.f32 %v1751_v44, %v823_v2  ;;  %v754_v1 = vmul.f32 %v1069_v59, %v1526_v18  ;;  %v634_v58 = vadd.f32 1e-05, %v570_v35  ;;  %v635_v56 = vadd.f32 1e-05, %v571_v6 }
 0x168   :  { %v895_v27 = vadd.f32 %v1751_v44, %v824_v62  ;;  %v755_v47 = vmul.f32 %v1071_v16, %v1533_v3  ;;  %v476_v39 = vpop.xlane.xlu1 %475  ;;  %v478_v29 = vpop.xlane.xlu0 %477 }
 0x169   :  { %958 = vst [vmem:[#allocation5 + $0x98] sm:$0xff] %v894_v55  ;;  %v825_v42 = vmul.f32 %v1745_v31, %v754_v1  ;;  %1084 = vrsqrt.f32 %v634_v58  ;;  %v572_v12 = vmul.f32 0.0078125, %v476_v39  ;;  %v573_v0 = vmul.f32 0.0078125, %v478_v29 }
 0x16a   :  { %v1073_v33 = vpop.eup %1072  ;;  %959 = vst [vmem:[#allocation5 + $0xa0] sm:$0xff] %v895_v27  ;;  %v826_v28 = vmul.f32 %v1745_v31, %v755_v47  ;;  %1086 = vrsqrt.f32 %v635_v56 }
 0x16b   :  { %v1075_v18 = vpop.eup %1074  ;;  %v896_v53 = vadd.f32 %v1751_v44, %v825_v42  ;;  %v756_v46 = vmul.f32 %v1073_v33, %v1536_v20  ;;  %v636_v8 = vadd.f32 1e-05, %v572_v12  ;;  %v637_v3 = vadd.f32 1e-05, %v573_v0 }
 0x16c   :  { %v897_v4 = vadd.f32 %v1751_v44, %v826_v28  ;;  %v757_v61 = vmul.f32 %v1075_v18, %v1543_v5  ;;  %v480_v37 = vpop.xlane.xlu1 %479  ;;  %v482_v54 = vpop.xlane.xlu0 %481 }
 0x16d   :  { %960 = vst [vmem:[#allocation5 + $0xa8] sm:$0xff] %v896_v53  ;;  %v827_v50 = vmul.f32 %v1745_v31, %v756_v46  ;;  %1088 = vrsqrt.f32 %v636_v8  ;;  %v574_v51 = vmul.f32 0.0078125, %v480_v37  ;;  %v575_v45 = vmul.f32 0.0078125, %v482_v54 }
 0x16e   :  { %v1077_v14 = vpop.eup %1076  ;;  %961 = vst [vmem:[#allocation5 + $0xb0] sm:$0xff] %v897_v4  ;;  %v828_v43 = vmul.f32 %v1745_v31, %v757_v61  ;;  %1090 = vrsqrt.f32 %v637_v3 }
 0x16f   :  { %v1079_v20 = vpop.eup %1078  ;;  %v898_v41 = vadd.f32 %v1751_v44, %v827_v50  ;;  %v758_v57 = vmul.f32 %v1077_v14, %v1546_v22  ;;  %v638_v60 = vadd.f32 1e-05, %v574_v51  ;;  %v639_v5 = vadd.f32 1e-05, %v575_v45 }
 0x170   :  { %v899_v49 = vadd.f32 %v1751_v44, %v828_v43  ;;  %v759_v52 = vmul.f32 %v1079_v20, %v1553_v7  ;;  %v484_v48 = vpop.xlane.xlu1 %483  ;;  %v486_v10 = vpop.xlane.xlu0 %485 }
 0x171   :  { %962 = vst [vmem:[#allocation5 + $0xb8] sm:$0xff] %v898_v41  ;;  %v829_v2 = vmul.f32 %v1745_v31, %v758_v57  ;;  %1092 = vrsqrt.f32 %v638_v60  ;;  %v576_v35 = vmul.f32 0.0078125, %v484_v48  ;;  %v577_v6 = vmul.f32 0.0078125, %v486_v10 }
 0x172   :  { %v1081_v59 = vpop.eup %1080  ;;  %963 = vst [vmem:[#allocation5 + $0xc0] sm:$0xff] %v899_v49  ;;  %v830_v62 = vmul.f32 %v1745_v31, %v759_v52  ;;  %1094 = vrsqrt.f32 %v639_v5 }
 0x173   :  { %v1083_v22 = vpop.eup %1082  ;;  %v900_v16 = vadd.f32 %v1751_v44, %v829_v2  ;;  %v760_v55 = vmul.f32 %v1081_v59, %v1556_v24  ;;  %v640_v1 = vadd.f32 1e-05, %v576_v35  ;;  %v641_v7 = vadd.f32 1e-05, %v577_v6 }
 0x174   :  { %v901_v58 = vadd.f32 %v1751_v44, %v830_v62  ;;  %v761_v56 = vmul.f32 %v1083_v22, %v1563_v9  ;;  %v488_v27 = vpop.xlane.xlu1 %487  ;;  %v490_v47 = vpop.xlane.xlu0 %489 }
 0x175   :  { %964 = vst [vmem:[#allocation5 + $0xc8] sm:$0xff] %v900_v16  ;;  %v831_v39 = vmul.f32 %v1745_v31, %v760_v55  ;;  %1096 = vrsqrt.f32 %v640_v1  ;;  %v578_v29 = vmul.f32 0.0078125, %v488_v27  ;;  %v579_v42 = vmul.f32 0.0078125, %v490_v47 }
 0x176   :  { %v1085_v12 = vpop.eup %1084  ;;  %965 = vst [vmem:[#allocation5 + $0xd0] sm:$0xff] %v901_v58  ;;  %v832_v0 = vmul.f32 %v1745_v31, %v761_v56  ;;  %1098 = vrsqrt.f32 %v641_v7 }
 0x177   :  { %v1087_v24 = vpop.eup %1086  ;;  %v902_v33 = vadd.f32 %v1751_v44, %v831_v39  ;;  %v762_v28 = vmul.f32 %v1085_v12, %v1566_v26  ;;  %v642_v18 = vadd.f32 1e-05, %v578_v29  ;;  %v643_v9 = vadd.f32 1e-05, %v579_v42 }
 0x178   :  { %v903_v53 = vadd.f32 %v1751_v44, %v832_v0  ;;  %v763_v46 = vmul.f32 %v1087_v24, %v1571_v11  ;;  %v492_v8 = vpop.xlane.xlu1 %491  ;;  %v494_v3 = vpop.xlane.xlu0 %493 }
 0x179   :  { %966 = vst [vmem:[#allocation5 + $0xd8] sm:$0xff] %v902_v33  ;;  %v833_v4 = vmul.f32 %v1745_v31, %v762_v28  ;;  %1100 = vrsqrt.f32 %v642_v18  ;;  %v580_v61 = vmul.f32 0.0078125, %v492_v8  ;;  %v581_v37 = vmul.f32 0.0078125, %v494_v3 }
 0x17a   :  { %v1089_v54 = vpop.eup %1088  ;;  %967 = vst [vmem:[#allocation5 + $0xe0] sm:$0xff] %v903_v53  ;;  %v834_v50 = vmul.f32 %v1745_v31, %v763_v46  ;;  %1102 = vrsqrt.f32 %v643_v9 }
 0x17b   :  { %v1091_v26 = vpop.eup %1090  ;;  %v904_v51 = vadd.f32 %v1751_v44, %v833_v4  ;;  %v764_v45 = vmul.f32 %v1089_v54, %v1574_v63  ;;  %v644_v14 = vadd.f32 1e-05, %v580_v61  ;;  %v645_v11 = vadd.f32 1e-05, %v581_v37 }
 0x17c   :  { %v905_v43 = vadd.f32 %v1751_v44, %v834_v50  ;;  %v765_v20 = vmul.f32 %v1091_v26, %v1581_v13  ;;  %v496_v41 = vpop.xlane.xlu1 %495  ;;  %v498_v57 = vpop.xlane.xlu0 %497 }
 0x17d   :  { %968 = vst [vmem:[#allocation5 + $0xe8] sm:$0xff] %v904_v51  ;;  %v835_v60 = vmul.f32 %v1745_v31, %v764_v45  ;;  %1104 = vrsqrt.f32 %v644_v14  ;;  %v582_v5 = vmul.f32 0.0078125, %v496_v41  ;;  %v583_v49 = vmul.f32 0.0078125, %v498_v57 }
 0x17e   :  { %v1093_v52 = vpop.eup %1092  ;;  %969 = vst [vmem:[#allocation5 + $0xf0] sm:$0xff] %v905_v43  ;;  %v836_v48 = vmul.f32 %v1745_v31, %v765_v20  ;;  %1106 = vrsqrt.f32 %v645_v11 }
 0x17f   :  { %v1095_v63 = vpop.eup %1094  ;;  %v906_v10 = vadd.f32 %v1751_v44, %v835_v60  ;;  %v766_v2 = vmul.f32 %v1093_v52, %v1584_v30  ;;  %v646_v35 = vadd.f32 1e-05, %v582_v5  ;;  %v647_v13 = vadd.f32 1e-05, %v583_v49 }
 0x180   :  { %v907_v6 = vadd.f32 %v1751_v44, %v836_v48  ;;  %v767_v59 = vmul.f32 %v1095_v63, %v1591_v15  ;;  %v500_v62 = vpop.xlane.xlu1 %499  ;;  %v502_v22 = vpop.xlane.xlu0 %501 }
 0x181   :  { %970 = vst [vmem:[#allocation5 + $0xf8] sm:$0xff] %v906_v10  ;;  %v837_v16 = vmul.f32 %v1745_v31, %v766_v2  ;;  %1108 = vrsqrt.f32 %v646_v35  ;;  %v584_v55 = vmul.f32 0.0078125, %v500_v62  ;;  %v585_v1 = vmul.f32 0.0078125, %v502_v22 }
 0x182   :  { %v1097_v7 = vpop.eup %1096  ;;  %971 = vst [vmem:[#allocation5 + $0x100] sm:$0xff] %v907_v6  ;;  %v838_v58 = vmul.f32 %v1745_v31, %v767_v59  ;;  %1110 = vrsqrt.f32 %v647_v13 }
 0x183   :  { %v1099_v30 = vpop.eup %1098  ;;  %v908_v56 = vadd.f32 %v1751_v44, %v837_v16  ;;  %v768_v27 = vmul.f32 %v1097_v7, %v1594_v32  ;;  %v648_v47 = vadd.f32 1e-05, %v584_v55  ;;  %v649_v15 = vadd.f32 1e-05, %v585_v1 }
 0x184   :  { %v909_v39 = vadd.f32 %v1751_v44, %v838_v58  ;;  %v769_v29 = vmul.f32 %v1099_v30, %v1601_v17  ;;  %v504_v42 = vpop.xlane.xlu1 %503  ;;  %v506_v12 = vpop.xlane.xlu0 %505 }
 0x185   :  { %972 = vst [vmem:[#allocation5 + $0x108] sm:$0xff] %v908_v56  ;;  %v839_v0 = vmul.f32 %v1745_v31, %v768_v27  ;;  %1112 = vrsqrt.f32 %v648_v47  ;;  %v586_v24 = vmul.f32 0.0078125, %v504_v42  ;;  %v587_v33 = vmul.f32 0.0078125, %v506_v12 }
 0x186   :  { %v1101_v28 = vpop.eup %1100  ;;  %973 = vst [vmem:[#allocation5 + $0x110] sm:$0xff] %v909_v39  ;;  %v840_v18 = vmul.f32 %v1745_v31, %v769_v29  ;;  %1114 = vrsqrt.f32 %v649_v15 }
 0x187   :  { %v1103_v32 = vpop.eup %1102  ;;  %v910_v9 = vadd.f32 %v1751_v44, %v839_v0  ;;  %v770_v53 = vmul.f32 %v1101_v28, %v1604_v34  ;;  %v650_v46 = vadd.f32 1e-05, %v586_v24  ;;  %v651_v17 = vadd.f32 1e-05, %v587_v33  ;;  %v2023_v33 = vld [vmem:[#allocation21_spill] sm:$0xff] }
 0x188   :  { %v911_v8 = vadd.f32 %v1751_v44, %v840_v18  ;;  %v771_v3 = vmul.f32 %v1103_v32, %v1611_v19  ;;  %v508_v4 = vpop.xlane.xlu1 %507  ;;  %v510_v61 = vpop.xlane.xlu0 %509 }
 0x189   :  { %974 = vst [vmem:[#allocation5 + $0x118] sm:$0xff] %v910_v9  ;;  %v841_v37 = vmul.f32 %v1745_v31, %v770_v53  ;;  %1116 = vrsqrt.f32 %v650_v46  ;;  %v588_v54 = vmul.f32 0.0078125, %v508_v4  ;;  %v589_v50 = vmul.f32 0.0078125, %v510_v61  ;;  %v2024_v9 = vld [vmem:[#allocation22_spill] sm:$0xff] }
 0x18a   :  { %v1105_v26 = vpop.eup %1104  ;;  %975 = vst [vmem:[#allocation5 + $0x120] sm:$0xff] %v911_v8  ;;  %v842_v51 = vmul.f32 %v1745_v31, %v771_v3  ;;  %1118 = vrsqrt.f32 %v651_v17 }
 0x18b   :  { %v1107_v34 = vpop.eup %1106  ;;  %v912_v45 = vadd.f32 %v1751_v44, %v841_v37  ;;  %v772_v14 = vmul.f32 %v1105_v26, %v1614_v36  ;;  %v652_v11 = vadd.f32 1e-05, %v588_v54  ;;  %v653_v19 = vadd.f32 1e-05, %v589_v50  ;;  %v2025_v26 = vld [vmem:[#allocation23_spill] sm:$0xff] }
 0x18c   :  { %v913_v43 = vadd.f32 %v1751_v44, %v842_v51  ;;  %v773_v20 = vmul.f32 %v1107_v34, %v1621_v21  ;;  %v512_v41 = vpop.xlane.xlu1 %511  ;;  %v514_v57 = vpop.xlane.xlu0 %513 }
 0x18d   :  { %976 = vst [vmem:[#allocation5 + $0x128] sm:$0xff] %v912_v45  ;;  %v843_v60 = vmul.f32 %v1745_v31, %v772_v14  ;;  %1120 = vrsqrt.f32 %v652_v11  ;;  %v590_v5 = vmul.f32 0.0078125, %v512_v41  ;;  %v591_v49 = vmul.f32 0.0078125, %v514_v57  ;;  %v2026_v11 = vld [vmem:[#allocation24_spill] sm:$0xff] }
 0x18e   :  { %v1109_v52 = vpop.eup %1108  ;;  %977 = vst [vmem:[#allocation5 + $0x130] sm:$0xff] %v913_v43  ;;  %v844_v48 = vmul.f32 %v1745_v31, %v773_v20  ;;  %1122 = vrsqrt.f32 %v653_v19 }
 0x18f   :  { %v1111_v36 = vpop.eup %1110  ;;  %v914_v63 = vadd.f32 %v1751_v44, %v843_v60  ;;  %v774_v10 = vmul.f32 %v1109_v52, %v1624_v38  ;;  %v654_v2 = vadd.f32 1e-05, %v590_v5  ;;  %v655_v21 = vadd.f32 1e-05, %v591_v49 }
 0x190   :  { %v915_v35 = vadd.f32 %v1751_v44, %v844_v48  ;;  %v775_v13 = vmul.f32 %v1111_v36, %v1631_v23  ;;  %v516_v6 = vpop.xlane.xlu1 %515  ;;  %v518_v59 = vpop.xlane.xlu0 %517  ;;  %v2027_v36 = vld [vmem:[#allocation25_spill] sm:$0xff] }
 0x191   :  { %978 = vst [vmem:[#allocation5 + $0x138] sm:$0xff] %v914_v63  ;;  %v845_v62 = vmul.f32 %v1745_v31, %v774_v10  ;;  %1124 = vrsqrt.f32 %v654_v2  ;;  %v592_v22 = vmul.f32 0.0078125, %v516_v6  ;;  %v593_v16 = vmul.f32 0.0078125, %v518_v59 }
 0x192   :  { %v1113_v55 = vpop.eup %1112  ;;  %979 = vst [vmem:[#allocation5 + $0x140] sm:$0xff] %v915_v35  ;;  %v846_v1 = vmul.f32 %v1745_v31, %v775_v13  ;;  %1126 = vrsqrt.f32 %v655_v21  ;;  %v2028_v35 = vld [vmem:[#allocation26_spill] sm:$0xff] }
 0x193   :  { %v1115_v38 = vpop.eup %1114  ;;  %v916_v7 = vadd.f32 %v1751_v44, %v845_v62  ;;  %v776_v58 = vmul.f32 %v1113_v55, %v1634_v40  ;;  %v656_v30 = vadd.f32 1e-05, %v592_v22  ;;  %v657_v23 = vadd.f32 1e-05, %v593_v16 }
 0x194   :  { %v917_v56 = vadd.f32 %v1751_v44, %v846_v1  ;;  %v777_v27 = vmul.f32 %v1115_v38, %v1641_v25  ;;  %v520_v47 = vpop.xlane.xlu1 %519  ;;  %v522_v15 = vpop.xlane.xlu0 %521 }
 0x195   :  { %980 = vst [vmem:[#allocation5 + $0x148] sm:$0xff] %v916_v7  ;;  %v847_v39 = vmul.f32 %v1745_v31, %v776_v58  ;;  %1128 = vrsqrt.f32 %v656_v30  ;;  %v594_v29 = vmul.f32 0.0078125, %v520_v47  ;;  %v595_v42 = vmul.f32 0.0078125, %v522_v15  ;;  %v2029_v58 = vld [vmem:[#allocation8_spill] sm:$0xff]  ;;  %v2030_v47 = vld [vmem:[#allocation9_spill] sm:$0xff] }
 0x196   :  { %v1117_v12 = vpop.eup %1116  ;;  %981 = vst [vmem:[#allocation5 + $0x150] sm:$0xff] %v917_v56  ;;  %v848_v0 = vmul.f32 %v1745_v31, %v777_v27  ;;  %1130 = vrsqrt.f32 %v657_v23 }
 0x197   :  { %v1119_v40 = vpop.eup %1118  ;;  %v918_v24 = vadd.f32 %v1751_v44, %v847_v39  ;;  %v778_v28 = vmul.f32 %v1117_v12, %v2023_v33  ;;  %v658_v18 = vadd.f32 1e-05, %v594_v29  ;;  %v659_v25 = vadd.f32 1e-05, %v595_v42 }
 0x198   :  { %v919_v32 = vadd.f32 %v1751_v44, %v848_v0  ;;  %v779_v53 = vmul.f32 %v1119_v40, %v2024_v9  ;;  %v524_v46 = vpop.xlane.xlu1 %523  ;;  %v526_v17 = vpop.xlane.xlu0 %525 }
 0x199   :  { %982 = vst [vmem:[#allocation5 + $0x158] sm:$0xff] %v918_v24  ;;  %v849_v8 = vmul.f32 %v1745_v31, %v778_v28  ;;  %1132 = vrsqrt.f32 %v658_v18  ;;  %v596_v3 = vmul.f32 0.0078125, %v524_v46  ;;  %v597_v4 = vmul.f32 0.0078125, %v526_v17  ;;  %v2031_v18 = vld [vmem:[#allocation10_spill] sm:$0xff]  ;;  %v2032_v46 = vld [vmem:[#allocation11_spill] sm:$0xff] }
 0x19a   :  { %v1121_v61 = vpop.eup %1120  ;;  %983 = vst [vmem:[#allocation5 + $0x160] sm:$0xff] %v919_v32  ;;  %v850_v37 = vmul.f32 %v1745_v31, %v779_v53  ;;  %1134 = vrsqrt.f32 %v659_v25 }
 0x19b   :  { %v1123_v54 = vpop.eup %1122  ;;  %v920_v50 = vadd.f32 %v1751_v44, %v849_v8  ;;  %v780_v51 = vmul.f32 %v1121_v61, %v2025_v26  ;;  %v660_v34 = vadd.f32 1e-05, %v596_v3  ;;  %v661_v45 = vadd.f32 1e-05, %v597_v4  ;;  %v2033_v26 = vld [vmem:[#allocation12_spill] sm:$0xff] }
 0x19c   :  { %v921_v14 = vadd.f32 %v1751_v44, %v850_v37  ;;  %v781_v19 = vmul.f32 %v1123_v54, %v2026_v11  ;;  %v528_v43 = vpop.xlane.xlu1 %527  ;;  %v530_v20 = vpop.xlane.xlu0 %529 }
 0x19d   :  { %984 = vst [vmem:[#allocation5 + $0x168] sm:$0xff] %v920_v50  ;;  %v851_v41 = vmul.f32 %v1745_v31, %v780_v51  ;;  %1136 = vrsqrt.f32 %v660_v34  ;;  %v598_v57 = vmul.f32 0.0078125, %v528_v43  ;;  %v599_v60 = vmul.f32 0.0078125, %v530_v20 }
 0x19e   :  { %v1125_v5 = vpop.eup %1124  ;;  %985 = vst [vmem:[#allocation5 + $0x170] sm:$0xff] %v921_v14  ;;  %v852_v49 = vmul.f32 %v1745_v31, %v781_v19  ;;  %1138 = vrsqrt.f32 %v661_v45  ;;  %v2034_v14 = vld [vmem:[#allocation13_spill] sm:$0xff] }
 0x19f   :  { %v1127_v52 = vpop.eup %1126  ;;  %v922_v48 = vadd.f32 %v1751_v44, %v851_v41  ;;  %v782_v63 = vmul.f32 %v1125_v5, %v2027_v36  ;;  %v662_v10 = vadd.f32 1e-05, %v598_v57  ;;  %v663_v2 = vadd.f32 1e-05, %v599_v60  ;;  %v2035_v60 = vld [vmem:[#allocation14_spill] sm:$0xff] }
 0x1a0   :  { %v923_v21 = vadd.f32 %v1751_v44, %v852_v49  ;;  %v783_v13 = vmul.f32 %v1127_v52, %v2028_v35  ;;  %v532_v6 = vpop.xlane.xlu1 %531  ;;  %v534_v59 = vpop.xlane.xlu0 %533  ;;  %v2036_v52 = vld [vmem:[#allocation15_spill] sm:$0xff]  ;;  %v1154_v36 = vld [vmem:[%s1943_s1] ss:$0 sm:$0xff]  ;;  %s1203_s1 = smov [#allocation5]  }
 0x1a1   :  { %986 = vst [vmem:[#allocation5 + $0x178] sm:$0xff] %v922_v48  ;;  %v853_v62 = vmul.f32 %v1745_v31, %v782_v63  ;;  %1140 = vrsqrt.f32 %v662_v10  ;;  %v600_v22 = vmul.f32 0.0078125, %v532_v6  ;;  %v601_v16 = vmul.f32 0.0078125, %v534_v59  ;;  %v2038_v59 = vld [vmem:[#allocation17_spill] sm:$0xff] }
 0x1a2   :  { %v1129_v55 = vpop.eup %1128  ;;  %987 = vst [vmem:[#allocation5 + $0x180] sm:$0xff] %v923_v21  ;;  %v854_v1 = vmul.f32 %v1745_v31, %v783_v13  ;;  %1142 = vrsqrt.f32 %v663_v2  ;;  %v2037_v13 = vld [vmem:[#allocation16_spill] sm:$0xff] }
 0x1a3   :  { %v1131_v38 = vpop.eup %1130  ;;  %v924_v7 = vadd.f32 %v1751_v44, %v853_v62  ;;  %v784_v30 = vmul.f32 %v1129_v55, %v2029_v58  ;;  %v664_v23 = vadd.f32 1e-05, %v600_v22  ;;  %v665_v56 = vadd.f32 1e-05, %v601_v16 }
 0x1a4   :  { %v925_v27 = vadd.f32 %v1751_v44, %v854_v1  ;;  %v785_v15 = vmul.f32 %v1131_v38, %v2030_v47  ;;  %v536_v39 = vpop.xlane.xlu1 %535  ;;  %v538_v29 = vpop.xlane.xlu0 %537 }
 0x1a5   :  { %988 = vst [vmem:[#allocation5 + $0x188] sm:$0xff] %v924_v7  ;;  %v855_v42 = vmul.f32 %v1745_v31, %v784_v30  ;;  %1144 = vrsqrt.f32 %v664_v23  ;;  %v602_v12 = vmul.f32 0.0078125, %v536_v39  ;;  %v603_v0 = vmul.f32 0.0078125, %v538_v29  ;;  %v2039_v7 = vld [vmem:[#allocation18_spill] sm:$0xff]  ;;  %v2040_v23 = vld [vmem:[#allocation27_spill] sm:$0xff] }
 0x1a6   :  { %v1133_v40 = vpop.eup %1132  ;;  %989 = vst [vmem:[#allocation5 + $0x190] sm:$0xff] %v925_v27  ;;  %v856_v24 = vmul.f32 %v1745_v31, %v785_v15  ;;  %1146 = vrsqrt.f32 %v665_v56  ;;  %v2041_v29 = vld [vmem:[#allocation19_spill] sm:$0xff] }
 0x1a7   :  { %v1135_v33 = vpop.eup %1134  ;;  %v926_v28 = vadd.f32 %v1751_v44, %v855_v42  ;;  %v786_v25 = vmul.f32 %v1133_v40, %v2031_v18  ;;  %v666_v32 = vadd.f32 1e-05, %v602_v12  ;;  %v667_v9 = vadd.f32 1e-05, %v603_v0 }
 0x1a8   :  { %v927_v53 = vadd.f32 %v1751_v44, %v856_v24  ;;  %v787_v17 = vmul.f32 %v1135_v33, %v2032_v46  ;;  %v540_v8 = vpop.xlane.xlu1 %539 }
 0x1a9   :  { %990 = vst [vmem:[#allocation5 + $0x198] sm:$0xff] %v926_v28  ;;  %v857_v3 = vmul.f32 %v1745_v31, %v786_v25  ;;  %1148 = vrsqrt.f32 %v666_v32  ;;  %v604_v4 = vmul.f32 0.0078125, %v540_v8 }
 0x1aa   :  { %v1137_v61 = vpop.eup %1136  ;;  %991 = vst [vmem:[#allocation5 + $0x1a0] sm:$0xff] %v927_v53  ;;  %v858_v37 = vmul.f32 %v1745_v31, %v787_v17  ;;  %1150 = vrsqrt.f32 %v667_v9 }
 0x1ab   :  { %v1139_v54 = vpop.eup %1138  ;;  %v928_v50 = vadd.f32 %v1751_v44, %v857_v3  ;;  %v788_v51 = vmul.f32 %v1137_v61, %v2033_v26  ;;  %v668_v34 = vadd.f32 1e-05, %v604_v4 }
 0x1ac   :  { %v929_v45 = vadd.f32 %v1751_v44, %v858_v37  ;;  %v789_v11 = vmul.f32 %v1139_v54, %v2034_v14 }
 0x1ad   :  { %992 = vst [vmem:[#allocation5 + $0x1a8] sm:$0xff] %v928_v50  ;;  %v859_v19 = vmul.f32 %v1745_v31, %v788_v51  ;;  %1152 = vrsqrt.f32 %v668_v34 }
 0x1ae   :  { %v1141_v43 = vpop.eup %1140  ;;  %993 = vst [vmem:[#allocation5 + $0x1b0] sm:$0xff] %v929_v45  ;;  %v860_v20 = vmul.f32 %v1745_v31, %v789_v11  ;;  %v1155_v31 = vld [vmem:[%s1944_s2] ss:$0 sm:$0xff]  ;;  %s1008_s2 = sshll.u32 %s1203_s1, 4  ;;  %s1009_s2 = int_to_ptr.vmem [resolvable:$true] %s1008_s2 }
 0x1af   :  { %v1143_v41 = vpop.eup %1142  ;;  %v930_v57 = vadd.f32 %v1751_v44, %v859_v19  ;;  %v790_v5 = vmul.f32 %v1141_v43, %v2035_v60  ;;  %s1176_s26 = scalar_lea.vmem %s1009_s2, 8192  ;;  %p1181_p6 = scmp.lt.s32.totalorder %s1009_s2, %s1009_s2 }
 0x1b0   :  { %v931_v49 = vadd.f32 %v1751_v44, %v860_v20  ;;  %v791_v48 = vmul.f32 %v1143_v41, %v2036_v52  ;;  %p1177_p5 = scmp.ne.s32.totalorder %s1009_s2, %s1176_s26  ;;  %p1182_p7 = scmp.lt.s32.totalorder %s1176_s26, %s1176_s26 }
 0x1b1   :  { %994 = vst [vmem:[#allocation5 + $0x1b8] sm:$0xff] %v930_v57  ;;  %v861_v63 = vmul.f32 %v1154_v36, %v790_v5 }
 0x1b2   :  { %v1145_v10 = vpop.eup %1144  ;;  %995 = vst [vmem:[#allocation5 + $0x1c0] sm:$0xff] %v931_v49  ;;  %v862_v2 = vmul.f32 %v1154_v36, %v791_v48  ;;  %p1183_p8 = por %p1182_p7, %p1181_p6 }
 0x1b3   :  { %v1147_v21 = vpop.eup %1146  ;;  %v932_v35 = vadd.f32 %v1155_v31, %v861_v63  ;;  %v792_v6 = vmul.f32 %v1145_v10, %v2037_v13 }
 0x1b4   :  { %v933_v44 = vadd.f32 %v1155_v31, %v862_v2  ;;  %v793_v62 = vmul.f32 %v1147_v21, %v2038_v59  ;;  %p1184_p9 = pnand %p1183_p8, %p1177_p5 }
 0x1b5   :  { %996 = vst [vmem:[#allocation5 + $0x1c8] sm:$0xff] %v932_v35  ;;  %v863_v22 = vmul.f32 %v1154_v36, %v792_v6 }
 0x1b6   :  { %v1149_v16 = vpop.eup %1148  ;;  %997 = vst [vmem:[#allocation5 + $0x1d0] sm:$0xff] %v933_v44  ;;  %v864_v55 = vmul.f32 %v1154_v36, %v793_v62 }
 0x1b7   :  { %v1151_v1 = vpop.eup %1150  ;;  %v934_v38 = vadd.f32 %v1155_v31, %v863_v22  ;;  %v794_v58 = vmul.f32 %v1149_v16, %v2039_v7 }
 0x1b8   :  { %v935_v30 = vadd.f32 %v1155_v31, %v864_v55  ;;  %v795_v56 = vmul.f32 %v1151_v1, %v2040_v23 }
 0x1b9   :  { %998 = vst [vmem:[#allocation5 + $0x1d8] sm:$0xff] %v934_v38  ;;  %v865_v27 = vmul.f32 %v1154_v36, %v794_v58 }
 0x1ba   :  { %v1153_v47 = vpop.eup %1152  ;;  %999 = vst [vmem:[#allocation5 + $0x1e0] sm:$0xff] %v935_v30  ;;  %v866_v15 = vmul.f32 %v1154_v36, %v795_v56 }
 0x1bb   :  { %v936_v39 = vadd.f32 %v1155_v31, %v865_v27  ;;  %v796_v42 = vmul.f32 %v1153_v47, %v2041_v29 }
 0x1bc   :  { %v937_v12 = vadd.f32 %v1155_v31, %v866_v15 }
 0x1bd   :  { %1000 = vst [vmem:[#allocation5 + $0x1e8] sm:$0xff] %v936_v39  ;;  %v867_v0 = vmul.f32 %v1154_v36, %v796_v42 }
 0x1be   :  { %1001 = vst [vmem:[#allocation5 + $0x1f0] sm:$0xff] %v937_v12 }
 0x1bf   :  { %v938_v40 = vadd.f32 %v1155_v31, %v867_v0 }
 0x1c1   :  { %1002 = vst [vmem:[#allocation5 + $0x1f8] sm:$0xff] %v938_v40 }
 0x1c2   :  { %1187 = shalt.err (!%p1184_p9)
}
 0x1c3   :  { %1014 = dma.vmem_to_hbm [thread:$0]  %s1009_s2, 8192, %s1945_s3, [#allocation4], %s1201_s15, %s1201_s15, %s1202_s16  }
 0x1c4   :  { %1198 = dma.done.wait [#allocation4], 8192  }
 0x1c5   :  { %1199 = vsyncadd [#allocation4], 4294959104 }
 0x1c6   :  { %1018 = vsyncpa [#allocation3], 1 }
 0x1c7   :  { %1019 = vsyncpa [#allocation4], 1 }

</bundles_post_ra>
